<compile_context>
chip_gen: v6e
topology: v6e:2x2x1
jax: 0.10.0
libtpu: 0.0.40
codegen_flags: <defaults>
</compile_context>

<pallas_src>
import math

import jax
import jax.numpy as jnp
from jax import lax
from jax.experimental import pallas as pl
from jax.experimental.pallas import tpu as pltpu

# ----------------------- miniature GPT-2 config -----------------------------
VOCAB = 128        # gpt2 vocab (50257) scaled down
D = 64             # hidden_dim (768) scaled down
N_HEADS = 4
HD = D // N_HEADS  # 16
N_LAYERS = 2
S = 8              # tokenized sequence length
B = 2              # batch
T = B * S          # total token rows processed jointly (16)
HT = N_HEADS * T   # all-heads score-matrix width (64)
D_FF = 4 * D
NEG_INF = -1e30
VEC_ROWS = 9       # packed per-layer (D,)-wide params (see init_params)

assert HD & (HD - 1) == 0 and S & (S - 1) == 0 and T & (T - 1) == 0


def _pow2_div(x, d):
    """x // d for non-negative int32 x and power-of-two d (division-free)."""
    return jnp.right_shift(x, int(math.log2(d)))


def _layer_norm(x, w, b, eps=1e-5):
    # fused statistics: mean and mean-of-squares are independent reductions
    mu = jnp.mean(x, axis=-1, keepdims=True)
    ms = jnp.mean(x * x, axis=-1, keepdims=True)
    var = ms - mu * mu
    return (x - mu) * lax.rsqrt(var + eps) * w + b


def gpt2_kernel(x_ref, wpe_ref, wqkv_ref, wproj_ref, wfc_ref, wfc2_ref,
                vecs_ref, bfc_ref, out_ref):
    f32 = jnp.float32
    bf16 = jnp.bfloat16

    # ---- static structural constants (traced once, hoisted out of the loop) --
    # n_mask[r, d]: score row r = h*T + s is "live" only for channels d of head h
    r_head = _pow2_div(lax.broadcasted_iota(jnp.int32, (HT, D), 0), T)
    d_head = _pow2_div(lax.broadcasted_iota(jnp.int32, (HT, D), 1), HD)
    n_mask = r_head == d_head                                          # (HT, D)

    # additive causal + same-batch bias for the (T, HT) all-heads score matrix
    t_idx = lax.broadcasted_iota(jnp.int32, (T, HT), 0)
    c_idx = lax.broadcasted_iota(jnp.int32, (T, HT), 1)
    s_idx = jnp.bitwise_and(c_idx, T - 1)      # source-token index in the block
    same_batch = _pow2_div(t_idx, S) == _pow2_div(s_idx, S)
    valid = jnp.logical_and(same_batch, s_idx <= t_idx)
    score_bias = jnp.where(valid, 0.0, NEG_INF).astype(f32)            # (T, HT)

    # indicator matrices for the grouped (per-head) softmax normalisation
    g_mat = jnp.where(
        _pow2_div(lax.broadcasted_iota(jnp.int32, (HT, N_HEADS), 0), T)
        == lax.broadcasted_iota(jnp.int32, (HT, N_HEADS), 1),
        1.0, 0.0)                                                      # (HT, H)
    gt_mat = jnp.where(
        _pow2_div(lax.broadcasted_iota(jnp.int32, (N_HEADS, HT), 1), T)
        == lax.broadcasted_iota(jnp.int32, (N_HEADS, HT), 0),
        1.0, 0.0)                                                      # (H, HT)

    def head_blockdiag(x):
        # x: (T, D) -> (HT, D) with row h*T+s holding x[s, d] iff head(d) == h
        return jnp.where(n_mask, jnp.concatenate([x] * N_HEADS, axis=0), 0.0)

    inv_sqrt_hd = 1.0 / math.sqrt(HD)

    # residual stream: both batch elements stacked as rows, f32 (T, D)
    h = (x_ref[...] + wpe_ref[...]).reshape(T, D)

    for l in range(N_LAYERS):
        base = l * VEC_ROWS
        ln1w, ln1b = vecs_ref[base + 0], vecs_ref[base + 1]
        ln2w, ln2b = vecs_ref[base + 2], vecs_ref[base + 3]
        bq, bk, bv = vecs_ref[base + 4], vecs_ref[base + 5], vecs_ref[base + 6]
        bproj, bfc2 = vecs_ref[base + 7], vecs_ref[base + 8]

        # ---------------- causal multi-head self-attention (pre-LN) ----------
        a_in = _layer_norm(h, ln1w, ln1b).astype(bf16)
        qkv = jnp.dot(a_in, wqkv_ref[l], preferred_element_type=f32)   # (T, 3D)
        q = qkv[:, 0:D] + bq
        k = qkv[:, D:2 * D] + bk
        v = qkv[:, 2 * D:3 * D] + bv

        # all heads' scores in one matmul: sc[t, h*T + s] = q_h[t] . k_h[s]
        k_bd = head_blockdiag(k).astype(bf16)                          # (HT, D)
        sc = lax.dot_general(q.astype(bf16), k_bd,
                             (((1,), (1,)), ((), ())),
                             preferred_element_type=f32)               # (T, HT)
        sc = sc * inv_sqrt_hd + score_bias

        # grouped (per-head) softmax.  The shared per-token row max leaves each
        # per-head softmax mathematically unchanged and is numerically stable.
        m_row = jnp.max(sc, axis=-1, keepdims=True)
        e = jnp.exp(sc - m_row)
        gsum = jnp.dot(e, g_mat, preferred_element_type=f32)           # (T, H)
        inv = pl.reciprocal(gsum, approx=True)
        p = e * jnp.dot(inv, gt_mat, preferred_element_type=f32)       # (T, HT)

        # all heads' context in one matmul:
        #   ctx[t, d] = sum_s p[t, head(d)*T + s] * v[s, d]
        v_bd = head_blockdiag(v).astype(bf16)                          # (HT, D)
        ctx = jnp.dot(p.astype(bf16), v_bd, preferred_element_type=f32)  # (T, D)

        attn = jnp.dot(ctx.astype(bf16), wproj_ref[l],
                       preferred_element_type=f32) + bproj
        h = h + attn

        # ---------------- GELU MLP (pre-LN) ----------------------------------
        m_in = _layer_norm(h, ln2w, ln2b).astype(bf16)
        ff = jnp.dot(m_in, wfc_ref[l], preferred_element_type=f32) + bfc_ref[l]
        ff = jax.nn.gelu(ff, approximate=True).astype(bf16)   # gpt2 "gelu_new"
        mlp = jnp.dot(ff, wfc2_ref[l], preferred_element_type=f32) + bfc2
        h = h + mlp

    # final ln_f only on the last token of each batch element
    # (text_outputs[:, -1, :]); single (B, D) store.
    lnfw = vecs_ref[N_LAYERS * VEC_ROWS + 0]
    lnfb = vecs_ref[N_LAYERS * VEC_ROWS + 1]
    h_last = jnp.concatenate(
        [h[b * S + S - 1: b * S + S, :] for b in range(B)], axis=0)    # (B, D)
    out_ref[...] = _layer_norm(h_last, lnfw, lnfb)


def gpt2_forward(x_enc, params):
    """x_enc: inputs_embeds (B, S, D) f32.  Returns last-token hidden (B, D)."""
    n_in = 1 + len(params)
    in_specs = [pl.BlockSpec(memory_space=pltpu.MemorySpace.VMEM)
                for _ in range(n_in)]
    out_spec = pl.BlockSpec(memory_space=pltpu.MemorySpace.VMEM)
    # Single invocation (no grid): the whole problem + miniature weights fit in
    # VMEM, so per-grid-step overhead and weight-ref revisits are eliminated.
    return pl.pallas_call(
        gpt2_kernel,
        out_shape=jax.ShapeDtypeStruct((B, D), jnp.float32),
        in_specs=in_specs,
        out_specs=out_spec,
    )(x_enc, *params)


def init_params(key):
    ks = jax.random.split(key, 6)

    def nrm(k, shape, scale=0.02):
        return (scale * jax.random.normal(k, shape)).astype(jnp.float32)

    wte = nrm(ks[0], (VOCAB, D))                     # token embedding
    wpe = nrm(ks[1], (S, D))                         # positional embedding
    wqkv = nrm(ks[2], (N_LAYERS, D, 3 * D))
    wproj = nrm(ks[3], (N_LAYERS, D, D))
    wfc = nrm(ks[4], (N_LAYERS, D, D_FF))
    wfc2 = nrm(ks[5], (N_LAYERS, D_FF, D))

    ln1w = jnp.ones((N_LAYERS, D), jnp.float32)
    ln1b = jnp.zeros((N_LAYERS, D), jnp.float32)
    ln2w = jnp.ones((N_LAYERS, D), jnp.float32)
    ln2b = jnp.zeros((N_LAYERS, D), jnp.float32)
    bqkv = jnp.zeros((N_LAYERS, 3 * D), jnp.float32)
    bproj = jnp.zeros((N_LAYERS, D), jnp.float32)
    bfc = jnp.zeros((N_LAYERS, D_FF), jnp.float32)
    bfc2 = jnp.zeros((N_LAYERS, D), jnp.float32)
    lnfw = jnp.ones((D,), jnp.float32)
    lnfb = jnp.zeros((D,), jnp.float32)

    # pack every (D,)-wide per-layer vector into one array -> fewer DMA refs
    rows = []
    for l in range(N_LAYERS):
        rows += [ln1w[l], ln1b[l], ln2w[l], ln2b[l],
                 bqkv[l, 0:D], bqkv[l, D:2 * D], bqkv[l, 2 * D:3 * D],
                 bproj[l], bfc2[l]]
    rows += [lnfw, lnfb]
    vecs = jnp.stack(rows, axis=0)                   # (N_LAYERS*VEC_ROWS+2, D)

    params = (wpe,
              wqkv.astype(jnp.bfloat16), wproj.astype(jnp.bfloat16),
              wfc.astype(jnp.bfloat16), wfc2.astype(jnp.bfloat16),
              vecs, bfc)
    return wte, params


if __name__ == "__main__":
    key = jax.random.PRNGKey(0)
    k_tok, k_param = jax.random.split(key)

    wte, params = init_params(k_param)

    # TODO(synk): GPT2Tokenizer (text -> token ids) has no Pallas equivalent;
    # deterministic synthetic token ids stand in for tokenizer output.
    token_ids = jax.random.randint(k_tok, (B, S), 0, VOCAB)

    # get_input_embeddings()(ids) — embedding gather stays in plain JAX glue.
    x_enc = wte[token_ids].astype(jnp.float32)       # (B, S, D) inputs_embeds

    out = gpt2_forward(x_enc, params)
    out = jax.block_until_ready(out)
    assert out.shape == (B, D) and out.dtype == jnp.float32
    assert bool(jnp.all(jnp.isfinite(out)))
    print("KERNEL_OK")
</pallas_src>

<mosaic_0001>
module attributes {stable_mosaic.version = 11 : i64} {
  func.func @gpt2_kernel(%arg0: memref<2x8x64xf32, #tpu.memory_space<vmem>>, %arg1: memref<8x64xf32, #tpu.memory_space<vmem>>, %arg2: memref<2x64x192xbf16, #tpu.memory_space<vmem>>, %arg3: memref<2x64x64xbf16, #tpu.memory_space<vmem>>, %arg4: memref<2x64x256xbf16, #tpu.memory_space<vmem>>, %arg5: memref<2x256x64xbf16, #tpu.memory_space<vmem>>, %arg6: memref<20x64xf32, #tpu.memory_space<vmem>>, %arg7: memref<2x256xf32, #tpu.memory_space<vmem>>, %arg8: memref<2x64xf32, #tpu.memory_space<vmem>>) attributes {dimension_semantics = [], scalar_prefetch = 0 : i64, scratch_operands = 0 : i64, tpu.core_type = #tpu.core_type<tc>} {
    %0 = tpu.iota {dimensions = array<i32: 0>} : vector<64x64xi32>
    %c4_i32 = arith.constant 4 : i32
    %1 = vector.broadcast %c4_i32 : i32 to vector<64x64xi32>
    %2 = arith.shrsi %0, %1 : vector<64x64xi32>
    %3 = tpu.iota {dimensions = array<i32: 1>} : vector<64x64xi32>
    %c4_i32_0 = arith.constant 4 : i32
    %4 = vector.broadcast %c4_i32_0 : i32 to vector<64x64xi32>
    %5 = arith.shrsi %3, %4 : vector<64x64xi32>
    %6 = arith.cmpi eq, %2, %5 : vector<64x64xi32>
    %7 = tpu.iota {dimensions = array<i32: 0>} : vector<16x64xi32>
    %8 = tpu.iota {dimensions = array<i32: 1>} : vector<16x64xi32>
    %c15_i32 = arith.constant 15 : i32
    %9 = vector.broadcast %c15_i32 : i32 to vector<16x64xi32>
    %10 = arith.andi %8, %9 : vector<16x64xi32>
    %c3_i32 = arith.constant 3 : i32
    %11 = vector.broadcast %c3_i32 : i32 to vector<16x64xi32>
    %12 = arith.shrsi %7, %11 : vector<16x64xi32>
    %c3_i32_1 = arith.constant 3 : i32
    %13 = vector.broadcast %c3_i32_1 : i32 to vector<16x64xi32>
    %14 = arith.shrsi %10, %13 : vector<16x64xi32>
    %15 = arith.cmpi eq, %12, %14 : vector<16x64xi32>
    %16 = arith.cmpi sle, %10, %7 : vector<16x64xi32>
    %17 = arith.andi %15, %16 : vector<16x64xi1>
    %cst = arith.constant 0.000000e+00 : f32
    %cst_2 = arith.constant -1.000000e+30 : f32
    %18 = vector.broadcast %cst : f32 to vector<16x64xf32>
    %19 = vector.broadcast %cst_2 : f32 to vector<16x64xf32>
    %20 = arith.select %17, %18, %19 : vector<16x64xi1>, vector<16x64xf32>
    %21 = tpu.iota {dimensions = array<i32: 0>} : vector<64x4xi32>
    %c4_i32_3 = arith.constant 4 : i32
    %22 = vector.broadcast %c4_i32_3 : i32 to vector<64x4xi32>
    %23 = arith.shrsi %21, %22 : vector<64x4xi32>
    %24 = tpu.iota {dimensions = array<i32: 1>} : vector<64x4xi32>
    %25 = arith.cmpi eq, %23, %24 : vector<64x4xi32>
    %cst_4 = arith.constant 1.000000e+00 : f32
    %cst_5 = arith.constant 0.000000e+00 : f32
    %26 = vector.broadcast %cst_4 : f32 to vector<64x4xf32>
    %27 = vector.broadcast %cst_5 : f32 to vector<64x4xf32>
    %28 = arith.select %25, %26, %27 : vector<64x4xi1>, vector<64x4xf32>
    %29 = tpu.iota {dimensions = array<i32: 1>} : vector<4x64xi32>
    %c4_i32_6 = arith.constant 4 : i32
    %30 = vector.broadcast %c4_i32_6 : i32 to vector<4x64xi32>
    %31 = arith.shrsi %29, %30 : vector<4x64xi32>
    %32 = tpu.iota {dimensions = array<i32: 0>} : vector<4x64xi32>
    %33 = arith.cmpi eq, %31, %32 : vector<4x64xi32>
    %cst_7 = arith.constant 1.000000e+00 : f32
    %cst_8 = arith.constant 0.000000e+00 : f32
    %34 = vector.broadcast %cst_7 : f32 to vector<4x64xf32>
    %35 = vector.broadcast %cst_8 : f32 to vector<4x64xf32>
    %36 = arith.select %33, %34, %35 : vector<4x64xi1>, vector<4x64xf32>
    %c0 = arith.constant 0 : index
    %c0_9 = arith.constant 0 : index
    %c0_10 = arith.constant 0 : index
    %37 = vector.load %arg0[%c0, %c0_9, %c0_10] : memref<2x8x64xf32, #tpu.memory_space<vmem>>, vector<2x8x64xf32>
    %c0_11 = arith.constant 0 : index
    %c0_12 = arith.constant 0 : index
    %38 = vector.load %arg1[%c0_11, %c0_12] : memref<8x64xf32, #tpu.memory_space<vmem>>, vector<8x64xf32>
    %39 = vector.shape_cast %38 : vector<8x64xf32> to vector<1x8x64xf32>
    %40 = vector.broadcast %39 : vector<1x8x64xf32> to vector<2x8x64xf32>
    %41 = arith.addf %37, %40 : vector<2x8x64xf32>
    %42 = vector.shape_cast %41 : vector<2x8x64xf32> to vector<16x64xf32>
    %c0_13 = arith.constant 0 : index
    %c0_14 = arith.constant 0 : index
    %43 = vector.load %arg6[%c0_13, %c0_14] : memref<20x64xf32, #tpu.memory_space<vmem>>, vector<1x64xf32>
    %44 = vector.shape_cast %43 : vector<1x64xf32> to vector<64xf32>
    %c1 = arith.constant 1 : index
    %c0_15 = arith.constant 0 : index
    %45 = vector.load %arg6[%c1, %c0_15] : memref<20x64xf32, #tpu.memory_space<vmem>>, vector<1x64xf32>
    %46 = vector.shape_cast %45 : vector<1x64xf32> to vector<64xf32>
    %c2 = arith.constant 2 : index
    %c0_16 = arith.constant 0 : index
    %47 = vector.load %arg6[%c2, %c0_16] : memref<20x64xf32, #tpu.memory_space<vmem>>, vector<1x64xf32>
    %48 = vector.shape_cast %47 : vector<1x64xf32> to vector<64xf32>
    %c3 = arith.constant 3 : index
    %c0_17 = arith.constant 0 : index
    %49 = vector.load %arg6[%c3, %c0_17] : memref<20x64xf32, #tpu.memory_space<vmem>>, vector<1x64xf32>
    %50 = vector.shape_cast %49 : vector<1x64xf32> to vector<64xf32>
    %c4 = arith.constant 4 : index
    %c0_18 = arith.constant 0 : index
    %51 = vector.load %arg6[%c4, %c0_18] : memref<20x64xf32, #tpu.memory_space<vmem>>, vector<1x64xf32>
    %52 = vector.shape_cast %51 : vector<1x64xf32> to vector<64xf32>
    %c5 = arith.constant 5 : index
    %c0_19 = arith.constant 0 : index
    %53 = vector.load %arg6[%c5, %c0_19] : memref<20x64xf32, #tpu.memory_space<vmem>>, vector<1x64xf32>
    %54 = vector.shape_cast %53 : vector<1x64xf32> to vector<64xf32>
    %c6 = arith.constant 6 : index
    %c0_20 = arith.constant 0 : index
    %55 = vector.load %arg6[%c6, %c0_20] : memref<20x64xf32, #tpu.memory_space<vmem>>, vector<1x64xf32>
    %56 = vector.shape_cast %55 : vector<1x64xf32> to vector<64xf32>
    %c7 = arith.constant 7 : index
    %c0_21 = arith.constant 0 : index
    %57 = vector.load %arg6[%c7, %c0_21] : memref<20x64xf32, #tpu.memory_space<vmem>>, vector<1x64xf32>
    %58 = vector.shape_cast %57 : vector<1x64xf32> to vector<64xf32>
    %c8 = arith.constant 8 : index
    %c0_22 = arith.constant 0 : index
    %59 = vector.load %arg6[%c8, %c0_22] : memref<20x64xf32, #tpu.memory_space<vmem>>, vector<1x64xf32>
    %60 = vector.shape_cast %59 : vector<1x64xf32> to vector<64xf32>
    %cst_23 = arith.constant dense<0.000000e+00> : vector<16xf32>
    %61 = vector.multi_reduction <add>, %42, %cst_23 [1] : vector<16x64xf32> to vector<16xf32>
    %62 = vector.shape_cast %61 : vector<16xf32> to vector<16x1xf32>
    %cst_24 = arith.constant 6.400000e+01 : f32
    %63 = vector.broadcast %cst_24 : f32 to vector<16x1xf32>
    %64 = arith.divf %62, %63 : vector<16x1xf32>
    %65 = arith.mulf %42, %42 : vector<16x64xf32>
    %cst_25 = arith.constant dense<0.000000e+00> : vector<16xf32>
    %66 = vector.multi_reduction <add>, %65, %cst_25 [1] : vector<16x64xf32> to vector<16xf32>
    %67 = vector.shape_cast %66 : vector<16xf32> to vector<16x1xf32>
    %cst_26 = arith.constant 6.400000e+01 : f32
    %68 = vector.broadcast %cst_26 : f32 to vector<16x1xf32>
    %69 = arith.divf %67, %68 : vector<16x1xf32>
    %70 = arith.mulf %64, %64 : vector<16x1xf32>
    %71 = arith.subf %69, %70 : vector<16x1xf32>
    %72 = vector.broadcast %64 : vector<16x1xf32> to vector<16x64xf32>
    %73 = arith.subf %42, %72 : vector<16x64xf32>
    %cst_27 = arith.constant 9.99999974E-6 : f32
    %74 = vector.broadcast %cst_27 : f32 to vector<16x1xf32>
    %75 = arith.addf %71, %74 : vector<16x1xf32>
    %76 = math.rsqrt %75 : vector<16x1xf32>
    %77 = vector.broadcast %76 : vector<16x1xf32> to vector<16x64xf32>
    %78 = arith.mulf %73, %77 : vector<16x64xf32>
    %79 = vector.shape_cast %44 : vector<64xf32> to vector<1x64xf32>
    %80 = vector.broadcast %79 : vector<1x64xf32> to vector<16x64xf32>
    %81 = arith.mulf %78, %80 : vector<16x64xf32>
    %82 = vector.shape_cast %46 : vector<64xf32> to vector<1x64xf32>
    %83 = vector.broadcast %82 : vector<1x64xf32> to vector<16x64xf32>
    %84 = arith.addf %81, %83 : vector<16x64xf32>
    %85 = arith.truncf %84 : vector<16x64xf32> to vector<16x64xbf16>
    %c0_28 = arith.constant 0 : index
    %c0_29 = arith.constant 0 : index
    %c0_30 = arith.constant 0 : index
    %86 = vector.load %arg2[%c0_28, %c0_29, %c0_30] : memref<2x64x192xbf16, #tpu.memory_space<vmem>>, vector<1x64x192xbf16>
    %87 = vector.shape_cast %86 : vector<1x64x192xbf16> to vector<64x192xbf16>
    %cst_31 = arith.constant dense<0.000000e+00> : vector<16x192xf32>
    %88 = tpu.matmul %85, %87, %cst_31 {dimension_numbers = #tpu.dot_dimension_numbers<[1], [0], [0], [1], [0, 0, 1, 1], [], []>} : vector<16x64xbf16>, vector<64x192xbf16>, vector<16x192xf32> -> vector<16x192xf32>
    %89 = vector.extract_strided_slice %88 {offsets = [0, 0], sizes = [16, 64], strides = [1, 1]} : vector<16x192xf32> to vector<16x64xf32>
    %90 = vector.shape_cast %52 : vector<64xf32> to vector<1x64xf32>
    %91 = vector.broadcast %90 : vector<1x64xf32> to vector<16x64xf32>
    %92 = arith.addf %89, %91 : vector<16x64xf32>
    %93 = vector.extract_strided_slice %88 {offsets = [0, 64], sizes = [16, 64], strides = [1, 1]} : vector<16x192xf32> to vector<16x64xf32>
    %94 = vector.shape_cast %54 : vector<64xf32> to vector<1x64xf32>
    %95 = vector.broadcast %94 : vector<1x64xf32> to vector<16x64xf32>
    %96 = arith.addf %93, %95 : vector<16x64xf32>
    %97 = vector.extract_strided_slice %88 {offsets = [0, 128], sizes = [16, 64], strides = [1, 1]} : vector<16x192xf32> to vector<16x64xf32>
    %98 = vector.shape_cast %56 : vector<64xf32> to vector<1x64xf32>
    %99 = vector.broadcast %98 : vector<1x64xf32> to vector<16x64xf32>
    %100 = arith.addf %97, %99 : vector<16x64xf32>
    %101 = tpu.concatenate %96, %96, %96, %96 in 0 : vector<16x64xf32>, vector<16x64xf32>, vector<16x64xf32>, vector<16x64xf32> -> vector<64x64xf32>
    %cst_32 = arith.constant 0.000000e+00 : f32
    %102 = vector.broadcast %cst_32 : f32 to vector<64x64xf32>
    %103 = arith.select %6, %101, %102 : vector<64x64xi1>, vector<64x64xf32>
    %104 = arith.truncf %103 : vector<64x64xf32> to vector<64x64xbf16>
    %105 = arith.truncf %92 : vector<16x64xf32> to vector<16x64xbf16>
    %cst_33 = arith.constant dense<0.000000e+00> : vector<16x64xf32>
    %106 = tpu.matmul %105, %104, %cst_33 {dimension_numbers = #tpu.dot_dimension_numbers<[1], [1], [0], [0], [0, 0, 1, 0], [], []>} : vector<16x64xbf16>, vector<64x64xbf16>, vector<16x64xf32> -> vector<16x64xf32>
    %cst_34 = arith.constant 2.500000e-01 : f32
    %107 = vector.broadcast %cst_34 : f32 to vector<16x64xf32>
    %108 = arith.mulf %106, %107 : vector<16x64xf32>
    %109 = arith.addf %108, %20 : vector<16x64xf32>
    %cst_35 = arith.constant dense<0xFF800000> : vector<16xf32>
    %110 = vector.multi_reduction <maximumf>, %109, %cst_35 [1] : vector<16x64xf32> to vector<16xf32>
    %111 = vector.shape_cast %110 : vector<16xf32> to vector<16x1xf32>
    %112 = vector.broadcast %111 : vector<16x1xf32> to vector<16x64xf32>
    %113 = arith.subf %109, %112 : vector<16x64xf32>
    %114 = math.exp %113 : vector<16x64xf32>
    %cst_36 = arith.constant dense<0.000000e+00> : vector<16x4xf32>
    %115 = tpu.matmul %114, %28, %cst_36 {dimension_numbers = #tpu.dot_dimension_numbers<[1], [0], [0], [1], [0, 0, 1, 1], [], []>} : vector<16x64xf32>, vector<64x4xf32>, vector<16x4xf32> -> vector<16x4xf32>
    %116 = tpu.reciprocal %115 {approx = true} : vector<16x4xf32> -> vector<16x4xf32>
    %cst_37 = arith.constant dense<0.000000e+00> : vector<16x64xf32>
    %117 = tpu.matmul %116, %36, %cst_37 {dimension_numbers = #tpu.dot_dimension_numbers<[1], [0], [0], [1], [0, 0, 1, 1], [], []>} : vector<16x4xf32>, vector<4x64xf32>, vector<16x64xf32> -> vector<16x64xf32>
    %118 = arith.mulf %114, %117 : vector<16x64xf32>
    %119 = tpu.concatenate %100, %100, %100, %100 in 0 : vector<16x64xf32>, vector<16x64xf32>, vector<16x64xf32>, vector<16x64xf32> -> vector<64x64xf32>
    %cst_38 = arith.constant 0.000000e+00 : f32
    %120 = vector.broadcast %cst_38 : f32 to vector<64x64xf32>
    %121 = arith.select %6, %119, %120 : vector<64x64xi1>, vector<64x64xf32>
    %122 = arith.truncf %121 : vector<64x64xf32> to vector<64x64xbf16>
    %123 = arith.truncf %118 : vector<16x64xf32> to vector<16x64xbf16>
    %cst_39 = arith.constant dense<0.000000e+00> : vector<16x64xf32>
    %124 = tpu.matmul %123, %122, %cst_39 {dimension_numbers = #tpu.dot_dimension_numbers<[1], [0], [0], [1], [0, 0, 1, 1], [], []>} : vector<16x64xbf16>, vector<64x64xbf16>, vector<16x64xf32> -> vector<16x64xf32>
    %125 = arith.truncf %124 : vector<16x64xf32> to vector<16x64xbf16>
    %c0_40 = arith.constant 0 : index
    %c0_41 = arith.constant 0 : index
    %c0_42 = arith.constant 0 : index
    %126 = vector.load %arg3[%c0_40, %c0_41, %c0_42] : memref<2x64x64xbf16, #tpu.memory_space<vmem>>, vector<1x64x64xbf16>
    %127 = vector.shape_cast %126 : vector<1x64x64xbf16> to vector<64x64xbf16>
    %cst_43 = arith.constant dense<0.000000e+00> : vector<16x64xf32>
    %128 = tpu.matmul %125, %127, %cst_43 {dimension_numbers = #tpu.dot_dimension_numbers<[1], [0], [0], [1], [0, 0, 1, 1], [], []>} : vector<16x64xbf16>, vector<64x64xbf16>, vector<16x64xf32> -> vector<16x64xf32>
    %129 = vector.shape_cast %58 : vector<64xf32> to vector<1x64xf32>
    %130 = vector.broadcast %129 : vector<1x64xf32> to vector<16x64xf32>
    %131 = arith.addf %128, %130 : vector<16x64xf32>
    %132 = arith.addf %42, %131 : vector<16x64xf32>
    %cst_44 = arith.constant dense<0.000000e+00> : vector<16xf32>
    %133 = vector.multi_reduction <add>, %132, %cst_44 [1] : vector<16x64xf32> to vector<16xf32>
    %134 = vector.shape_cast %133 : vector<16xf32> to vector<16x1xf32>
    %cst_45 = arith.constant 6.400000e+01 : f32
    %135 = vector.broadcast %cst_45 : f32 to vector<16x1xf32>
    %136 = arith.divf %134, %135 : vector<16x1xf32>
    %137 = arith.mulf %132, %132 : vector<16x64xf32>
    %cst_46 = arith.constant dense<0.000000e+00> : vector<16xf32>
    %138 = vector.multi_reduction <add>, %137, %cst_46 [1] : vector<16x64xf32> to vector<16xf32>
    %139 = vector.shape_cast %138 : vector<16xf32> to vector<16x1xf32>
    %cst_47 = arith.constant 6.400000e+01 : f32
    %140 = vector.broadcast %cst_47 : f32 to vector<16x1xf32>
    %141 = arith.divf %139, %140 : vector<16x1xf32>
    %142 = arith.mulf %136, %136 : vector<16x1xf32>
    %143 = arith.subf %141, %142 : vector<16x1xf32>
    %144 = vector.broadcast %136 : vector<16x1xf32> to vector<16x64xf32>
    %145 = arith.subf %132, %144 : vector<16x64xf32>
    %cst_48 = arith.constant 9.99999974E-6 : f32
    %146 = vector.broadcast %cst_48 : f32 to vector<16x1xf32>
    %147 = arith.addf %143, %146 : vector<16x1xf32>
    %148 = math.rsqrt %147 : vector<16x1xf32>
    %149 = vector.broadcast %148 : vector<16x1xf32> to vector<16x64xf32>
    %150 = arith.mulf %145, %149 : vector<16x64xf32>
    %151 = vector.shape_cast %48 : vector<64xf32> to vector<1x64xf32>
    %152 = vector.broadcast %151 : vector<1x64xf32> to vector<16x64xf32>
    %153 = arith.mulf %150, %152 : vector<16x64xf32>
    %154 = vector.shape_cast %50 : vector<64xf32> to vector<1x64xf32>
    %155 = vector.broadcast %154 : vector<1x64xf32> to vector<16x64xf32>
    %156 = arith.addf %153, %155 : vector<16x64xf32>
    %157 = arith.truncf %156 : vector<16x64xf32> to vector<16x64xbf16>
    %c0_49 = arith.constant 0 : index
    %c0_50 = arith.constant 0 : index
    %c0_51 = arith.constant 0 : index
    %158 = vector.load %arg4[%c0_49, %c0_50, %c0_51] : memref<2x64x256xbf16, #tpu.memory_space<vmem>>, vector<1x64x256xbf16>
    %159 = vector.shape_cast %158 : vector<1x64x256xbf16> to vector<64x256xbf16>
    %cst_52 = arith.constant dense<0.000000e+00> : vector<16x256xf32>
    %160 = tpu.matmul %157, %159, %cst_52 {dimension_numbers = #tpu.dot_dimension_numbers<[1], [0], [0], [1], [0, 0, 1, 1], [], []>} : vector<16x64xbf16>, vector<64x256xbf16>, vector<16x256xf32> -> vector<16x256xf32>
    %c0_53 = arith.constant 0 : index
    %c0_54 = arith.constant 0 : index
    %161 = vector.load %arg7[%c0_53, %c0_54] : memref<2x256xf32, #tpu.memory_space<vmem>>, vector<1x256xf32>
    %162 = vector.shape_cast %161 : vector<1x256xf32> to vector<256xf32>
    %163 = vector.shape_cast %162 : vector<256xf32> to vector<1x256xf32>
    %164 = vector.broadcast %163 : vector<1x256xf32> to vector<16x256xf32>
    %165 = arith.addf %160, %164 : vector<16x256xf32>
    %166 = arith.mulf %165, %165 : vector<16x256xf32>
    %167 = arith.mulf %165, %166 : vector<16x256xf32>
    %cst_55 = arith.constant 4.471500e-02 : f32
    %168 = vector.broadcast %cst_55 : f32 to vector<16x256xf32>
    %169 = arith.mulf %168, %167 : vector<16x256xf32>
    %170 = arith.addf %165, %169 : vector<16x256xf32>
    %cst_56 = arith.constant 0.797884583 : f32
    %171 = vector.broadcast %cst_56 : f32 to vector<16x256xf32>
    %172 = arith.mulf %171, %170 : vector<16x256xf32>
    %173 = math.tanh %172 : vector<16x256xf32>
    %cst_57 = arith.constant 1.000000e+00 : f32
    %174 = vector.broadcast %cst_57 : f32 to vector<16x256xf32>
    %175 = arith.addf %174, %173 : vector<16x256xf32>
    %cst_58 = arith.constant 5.000000e-01 : f32
    %176 = vector.broadcast %cst_58 : f32 to vector<16x256xf32>
    %177 = arith.mulf %176, %175 : vector<16x256xf32>
    %178 = arith.mulf %165, %177 : vector<16x256xf32>
    %179 = arith.truncf %178 : vector<16x256xf32> to vector<16x256xbf16>
    %c0_59 = arith.constant 0 : index
    %c0_60 = arith.constant 0 : index
    %c0_61 = arith.constant 0 : index
    %180 = vector.load %arg5[%c0_59, %c0_60, %c0_61] : memref<2x256x64xbf16, #tpu.memory_space<vmem>>, vector<1x256x64xbf16>
    %181 = vector.shape_cast %180 : vector<1x256x64xbf16> to vector<256x64xbf16>
    %cst_62 = arith.constant dense<0.000000e+00> : vector<16x64xf32>
    %182 = tpu.matmul %179, %181, %cst_62 {dimension_numbers = #tpu.dot_dimension_numbers<[1], [0], [0], [1], [0, 0, 1, 1], [], []>} : vector<16x256xbf16>, vector<256x64xbf16>, vector<16x64xf32> -> vector<16x64xf32>
    %183 = vector.shape_cast %60 : vector<64xf32> to vector<1x64xf32>
    %184 = vector.broadcast %183 : vector<1x64xf32> to vector<16x64xf32>
    %185 = arith.addf %182, %184 : vector<16x64xf32>
    %186 = arith.addf %132, %185 : vector<16x64xf32>
    %c9 = arith.constant 9 : index
    %c0_63 = arith.constant 0 : index
    %187 = vector.load %arg6[%c9, %c0_63] : memref<20x64xf32, #tpu.memory_space<vmem>>, vector<1x64xf32>
    %188 = vector.shape_cast %187 : vector<1x64xf32> to vector<64xf32>
    %c10 = arith.constant 10 : index
    %c0_64 = arith.constant 0 : index
    %189 = vector.load %arg6[%c10, %c0_64] : memref<20x64xf32, #tpu.memory_space<vmem>>, vector<1x64xf32>
    %190 = vector.shape_cast %189 : vector<1x64xf32> to vector<64xf32>
    %c11 = arith.constant 11 : index
    %c0_65 = arith.constant 0 : index
    %191 = vector.load %arg6[%c11, %c0_65] : memref<20x64xf32, #tpu.memory_space<vmem>>, vector<1x64xf32>
    %192 = vector.shape_cast %191 : vector<1x64xf32> to vector<64xf32>
    %c12 = arith.constant 12 : index
    %c0_66 = arith.constant 0 : index
    %193 = vector.load %arg6[%c12, %c0_66] : memref<20x64xf32, #tpu.memory_space<vmem>>, vector<1x64xf32>
    %194 = vector.shape_cast %193 : vector<1x64xf32> to vector<64xf32>
    %c13 = arith.constant 13 : index
    %c0_67 = arith.constant 0 : index
    %195 = vector.load %arg6[%c13, %c0_67] : memref<20x64xf32, #tpu.memory_space<vmem>>, vector<1x64xf32>
    %196 = vector.shape_cast %195 : vector<1x64xf32> to vector<64xf32>
    %c14 = arith.constant 14 : index
    %c0_68 = arith.constant 0 : index
    %197 = vector.load %arg6[%c14, %c0_68] : memref<20x64xf32, #tpu.memory_space<vmem>>, vector<1x64xf32>
    %198 = vector.shape_cast %197 : vector<1x64xf32> to vector<64xf32>
    %c15 = arith.constant 15 : index
    %c0_69 = arith.constant 0 : index
    %199 = vector.load %arg6[%c15, %c0_69] : memref<20x64xf32, #tpu.memory_space<vmem>>, vector<1x64xf32>
    %200 = vector.shape_cast %199 : vector<1x64xf32> to vector<64xf32>
    %c16 = arith.constant 16 : index
    %c0_70 = arith.constant 0 : index
    %201 = vector.load %arg6[%c16, %c0_70] : memref<20x64xf32, #tpu.memory_space<vmem>>, vector<1x64xf32>
    %202 = vector.shape_cast %201 : vector<1x64xf32> to vector<64xf32>
    %c17 = arith.constant 17 : index
    %c0_71 = arith.constant 0 : index
    %203 = vector.load %arg6[%c17, %c0_71] : memref<20x64xf32, #tpu.memory_space<vmem>>, vector<1x64xf32>
    %204 = vector.shape_cast %203 : vector<1x64xf32> to vector<64xf32>
    %cst_72 = arith.constant dense<0.000000e+00> : vector<16xf32>
    %205 = vector.multi_reduction <add>, %186, %cst_72 [1] : vector<16x64xf32> to vector<16xf32>
    %206 = vector.shape_cast %205 : vector<16xf32> to vector<16x1xf32>
    %cst_73 = arith.constant 6.400000e+01 : f32
    %207 = vector.broadcast %cst_73 : f32 to vector<16x1xf32>
    %208 = arith.divf %206, %207 : vector<16x1xf32>
    %209 = arith.mulf %186, %186 : vector<16x64xf32>
    %cst_74 = arith.constant dense<0.000000e+00> : vector<16xf32>
    %210 = vector.multi_reduction <add>, %209, %cst_74 [1] : vector<16x64xf32> to vector<16xf32>
    %211 = vector.shape_cast %210 : vector<16xf32> to vector<16x1xf32>
    %cst_75 = arith.constant 6.400000e+01 : f32
    %212 = vector.broadcast %cst_75 : f32 to vector<16x1xf32>
    %213 = arith.divf %211, %212 : vector<16x1xf32>
    %214 = arith.mulf %208, %208 : vector<16x1xf32>
    %215 = arith.subf %213, %214 : vector<16x1xf32>
    %216 = vector.broadcast %208 : vector<16x1xf32> to vector<16x64xf32>
    %217 = arith.subf %186, %216 : vector<16x64xf32>
    %cst_76 = arith.constant 9.99999974E-6 : f32
    %218 = vector.broadcast %cst_76 : f32 to vector<16x1xf32>
    %219 = arith.addf %215, %218 : vector<16x1xf32>
    %220 = math.rsqrt %219 : vector<16x1xf32>
    %221 = vector.broadcast %220 : vector<16x1xf32> to vector<16x64xf32>
    %222 = arith.mulf %217, %221 : vector<16x64xf32>
    %223 = vector.shape_cast %188 : vector<64xf32> to vector<1x64xf32>
    %224 = vector.broadcast %223 : vector<1x64xf32> to vector<16x64xf32>
    %225 = arith.mulf %222, %224 : vector<16x64xf32>
    %226 = vector.shape_cast %190 : vector<64xf32> to vector<1x64xf32>
    %227 = vector.broadcast %226 : vector<1x64xf32> to vector<16x64xf32>
    %228 = arith.addf %225, %227 : vector<16x64xf32>
    %229 = arith.truncf %228 : vector<16x64xf32> to vector<16x64xbf16>
    %c1_77 = arith.constant 1 : index
    %c0_78 = arith.constant 0 : index
    %c0_79 = arith.constant 0 : index
    %230 = vector.load %arg2[%c1_77, %c0_78, %c0_79] : memref<2x64x192xbf16, #tpu.memory_space<vmem>>, vector<1x64x192xbf16>
    %231 = vector.shape_cast %230 : vector<1x64x192xbf16> to vector<64x192xbf16>
    %cst_80 = arith.constant dense<0.000000e+00> : vector<16x192xf32>
    %232 = tpu.matmul %229, %231, %cst_80 {dimension_numbers = #tpu.dot_dimension_numbers<[1], [0], [0], [1], [0, 0, 1, 1], [], []>} : vector<16x64xbf16>, vector<64x192xbf16>, vector<16x192xf32> -> vector<16x192xf32>
    %233 = vector.extract_strided_slice %232 {offsets = [0, 0], sizes = [16, 64], strides = [1, 1]} : vector<16x192xf32> to vector<16x64xf32>
    %234 = vector.shape_cast %196 : vector<64xf32> to vector<1x64xf32>
    %235 = vector.broadcast %234 : vector<1x64xf32> to vector<16x64xf32>
    %236 = arith.addf %233, %235 : vector<16x64xf32>
    %237 = vector.extract_strided_slice %232 {offsets = [0, 64], sizes = [16, 64], strides = [1, 1]} : vector<16x192xf32> to vector<16x64xf32>
    %238 = vector.shape_cast %198 : vector<64xf32> to vector<1x64xf32>
    %239 = vector.broadcast %238 : vector<1x64xf32> to vector<16x64xf32>
    %240 = arith.addf %237, %239 : vector<16x64xf32>
    %241 = vector.extract_strided_slice %232 {offsets = [0, 128], sizes = [16, 64], strides = [1, 1]} : vector<16x192xf32> to vector<16x64xf32>
    %242 = vector.shape_cast %200 : vector<64xf32> to vector<1x64xf32>
    %243 = vector.broadcast %242 : vector<1x64xf32> to vector<16x64xf32>
    %244 = arith.addf %241, %243 : vector<16x64xf32>
    %245 = tpu.concatenate %240, %240, %240, %240 in 0 : vector<16x64xf32>, vector<16x64xf32>, vector<16x64xf32>, vector<16x64xf32> -> vector<64x64xf32>
    %cst_81 = arith.constant 0.000000e+00 : f32
    %246 = vector.broadcast %cst_81 : f32 to vector<64x64xf32>
    %247 = arith.select %6, %245, %246 : vector<64x64xi1>, vector<64x64xf32>
    %248 = arith.truncf %247 : vector<64x64xf32> to vector<64x64xbf16>
    %249 = arith.truncf %236 : vector<16x64xf32> to vector<16x64xbf16>
    %cst_82 = arith.constant dense<0.000000e+00> : vector<16x64xf32>
    %250 = tpu.matmul %249, %248, %cst_82 {dimension_numbers = #tpu.dot_dimension_numbers<[1], [1], [0], [0], [0, 0, 1, 0], [], []>} : vector<16x64xbf16>, vector<64x64xbf16>, vector<16x64xf32> -> vector<16x64xf32>
    %cst_83 = arith.constant 2.500000e-01 : f32
    %251 = vector.broadcast %cst_83 : f32 to vector<16x64xf32>
    %252 = arith.mulf %250, %251 : vector<16x64xf32>
    %253 = arith.addf %252, %20 : vector<16x64xf32>
    %cst_84 = arith.constant dense<0xFF800000> : vector<16xf32>
    %254 = vector.multi_reduction <maximumf>, %253, %cst_84 [1] : vector<16x64xf32> to vector<16xf32>
    %255 = vector.shape_cast %254 : vector<16xf32> to vector<16x1xf32>
    %256 = vector.broadcast %255 : vector<16x1xf32> to vector<16x64xf32>
    %257 = arith.subf %253, %256 : vector<16x64xf32>
    %258 = math.exp %257 : vector<16x64xf32>
    %cst_85 = arith.constant dense<0.000000e+00> : vector<16x4xf32>
    %259 = tpu.matmul %258, %28, %cst_85 {dimension_numbers = #tpu.dot_dimension_numbers<[1], [0], [0], [1], [0, 0, 1, 1], [], []>} : vector<16x64xf32>, vector<64x4xf32>, vector<16x4xf32> -> vector<16x4xf32>
    %260 = tpu.reciprocal %259 {approx = true} : vector<16x4xf32> -> vector<16x4xf32>
    %cst_86 = arith.constant dense<0.000000e+00> : vector<16x64xf32>
    %261 = tpu.matmul %260, %36, %cst_86 {dimension_numbers = #tpu.dot_dimension_numbers<[1], [0], [0], [1], [0, 0, 1, 1], [], []>} : vector<16x4xf32>, vector<4x64xf32>, vector<16x64xf32> -> vector<16x64xf32>
    %262 = arith.mulf %258, %261 : vector<16x64xf32>
    %263 = tpu.concatenate %244, %244, %244, %244 in 0 : vector<16x64xf32>, vector<16x64xf32>, vector<16x64xf32>, vector<16x64xf32> -> vector<64x64xf32>
    %cst_87 = arith.constant 0.000000e+00 : f32
    %264 = vector.broadcast %cst_87 : f32 to vector<64x64xf32>
    %265 = arith.select %6, %263, %264 : vector<64x64xi1>, vector<64x64xf32>
    %266 = arith.truncf %265 : vector<64x64xf32> to vector<64x64xbf16>
    %267 = arith.truncf %262 : vector<16x64xf32> to vector<16x64xbf16>
    %cst_88 = arith.constant dense<0.000000e+00> : vector<16x64xf32>
    %268 = tpu.matmul %267, %266, %cst_88 {dimension_numbers = #tpu.dot_dimension_numbers<[1], [0], [0], [1], [0, 0, 1, 1], [], []>} : vector<16x64xbf16>, vector<64x64xbf16>, vector<16x64xf32> -> vector<16x64xf32>
    %269 = arith.truncf %268 : vector<16x64xf32> to vector<16x64xbf16>
    %c1_89 = arith.constant 1 : index
    %c0_90 = arith.constant 0 : index
    %c0_91 = arith.constant 0 : index
    %270 = vector.load %arg3[%c1_89, %c0_90, %c0_91] : memref<2x64x64xbf16, #tpu.memory_space<vmem>>, vector<1x64x64xbf16>
    %271 = vector.shape_cast %270 : vector<1x64x64xbf16> to vector<64x64xbf16>
    %cst_92 = arith.constant dense<0.000000e+00> : vector<16x64xf32>
    %272 = tpu.matmul %269, %271, %cst_92 {dimension_numbers = #tpu.dot_dimension_numbers<[1], [0], [0], [1], [0, 0, 1, 1], [], []>} : vector<16x64xbf16>, vector<64x64xbf16>, vector<16x64xf32> -> vector<16x64xf32>
    %273 = vector.shape_cast %202 : vector<64xf32> to vector<1x64xf32>
    %274 = vector.broadcast %273 : vector<1x64xf32> to vector<16x64xf32>
    %275 = arith.addf %272, %274 : vector<16x64xf32>
    %276 = arith.addf %186, %275 : vector<16x64xf32>
    %cst_93 = arith.constant dense<0.000000e+00> : vector<16xf32>
    %277 = vector.multi_reduction <add>, %276, %cst_93 [1] : vector<16x64xf32> to vector<16xf32>
    %278 = vector.shape_cast %277 : vector<16xf32> to vector<16x1xf32>
    %cst_94 = arith.constant 6.400000e+01 : f32
    %279 = vector.broadcast %cst_94 : f32 to vector<16x1xf32>
    %280 = arith.divf %278, %279 : vector<16x1xf32>
    %281 = arith.mulf %276, %276 : vector<16x64xf32>
    %cst_95 = arith.constant dense<0.000000e+00> : vector<16xf32>
    %282 = vector.multi_reduction <add>, %281, %cst_95 [1] : vector<16x64xf32> to vector<16xf32>
    %283 = vector.shape_cast %282 : vector<16xf32> to vector<16x1xf32>
    %cst_96 = arith.constant 6.400000e+01 : f32
    %284 = vector.broadcast %cst_96 : f32 to vector<16x1xf32>
    %285 = arith.divf %283, %284 : vector<16x1xf32>
    %286 = arith.mulf %280, %280 : vector<16x1xf32>
    %287 = arith.subf %285, %286 : vector<16x1xf32>
    %288 = vector.broadcast %280 : vector<16x1xf32> to vector<16x64xf32>
    %289 = arith.subf %276, %288 : vector<16x64xf32>
    %cst_97 = arith.constant 9.99999974E-6 : f32
    %290 = vector.broadcast %cst_97 : f32 to vector<16x1xf32>
    %291 = arith.addf %287, %290 : vector<16x1xf32>
    %292 = math.rsqrt %291 : vector<16x1xf32>
    %293 = vector.broadcast %292 : vector<16x1xf32> to vector<16x64xf32>
    %294 = arith.mulf %289, %293 : vector<16x64xf32>
    %295 = vector.shape_cast %192 : vector<64xf32> to vector<1x64xf32>
    %296 = vector.broadcast %295 : vector<1x64xf32> to vector<16x64xf32>
    %297 = arith.mulf %294, %296 : vector<16x64xf32>
    %298 = vector.shape_cast %194 : vector<64xf32> to vector<1x64xf32>
    %299 = vector.broadcast %298 : vector<1x64xf32> to vector<16x64xf32>
    %300 = arith.addf %297, %299 : vector<16x64xf32>
    %301 = arith.truncf %300 : vector<16x64xf32> to vector<16x64xbf16>
    %c1_98 = arith.constant 1 : index
    %c0_99 = arith.constant 0 : index
    %c0_100 = arith.constant 0 : index
    %302 = vector.load %arg4[%c1_98, %c0_99, %c0_100] : memref<2x64x256xbf16, #tpu.memory_space<vmem>>, vector<1x64x256xbf16>
    %303 = vector.shape_cast %302 : vector<1x64x256xbf16> to vector<64x256xbf16>
    %cst_101 = arith.constant dense<0.000000e+00> : vector<16x256xf32>
    %304 = tpu.matmul %301, %303, %cst_101 {dimension_numbers = #tpu.dot_dimension_numbers<[1], [0], [0], [1], [0, 0, 1, 1], [], []>} : vector<16x64xbf16>, vector<64x256xbf16>, vector<16x256xf32> -> vector<16x256xf32>
    %c1_102 = arith.constant 1 : index
    %c0_103 = arith.constant 0 : index
    %305 = vector.load %arg7[%c1_102, %c0_103] : memref<2x256xf32, #tpu.memory_space<vmem>>, vector<1x256xf32>
    %306 = vector.shape_cast %305 : vector<1x256xf32> to vector<256xf32>
    %307 = vector.shape_cast %306 : vector<256xf32> to vector<1x256xf32>
    %308 = vector.broadcast %307 : vector<1x256xf32> to vector<16x256xf32>
    %309 = arith.addf %304, %308 : vector<16x256xf32>
    %310 = arith.mulf %309, %309 : vector<16x256xf32>
    %311 = arith.mulf %309, %310 : vector<16x256xf32>
    %cst_104 = arith.constant 4.471500e-02 : f32
    %312 = vector.broadcast %cst_104 : f32 to vector<16x256xf32>
    %313 = arith.mulf %312, %311 : vector<16x256xf32>
    %314 = arith.addf %309, %313 : vector<16x256xf32>
    %cst_105 = arith.constant 0.797884583 : f32
    %315 = vector.broadcast %cst_105 : f32 to vector<16x256xf32>
    %316 = arith.mulf %315, %314 : vector<16x256xf32>
    %317 = math.tanh %316 : vector<16x256xf32>
    %cst_106 = arith.constant 1.000000e+00 : f32
    %318 = vector.broadcast %cst_106 : f32 to vector<16x256xf32>
    %319 = arith.addf %318, %317 : vector<16x256xf32>
    %cst_107 = arith.constant 5.000000e-01 : f32
    %320 = vector.broadcast %cst_107 : f32 to vector<16x256xf32>
    %321 = arith.mulf %320, %319 : vector<16x256xf32>
    %322 = arith.mulf %309, %321 : vector<16x256xf32>
    %323 = arith.truncf %322 : vector<16x256xf32> to vector<16x256xbf16>
    %c1_108 = arith.constant 1 : index
    %c0_109 = arith.constant 0 : index
    %c0_110 = arith.constant 0 : index
    %324 = vector.load %arg5[%c1_108, %c0_109, %c0_110] : memref<2x256x64xbf16, #tpu.memory_space<vmem>>, vector<1x256x64xbf16>
    %325 = vector.shape_cast %324 : vector<1x256x64xbf16> to vector<256x64xbf16>
    %cst_111 = arith.constant dense<0.000000e+00> : vector<16x64xf32>
    %326 = tpu.matmul %323, %325, %cst_111 {dimension_numbers = #tpu.dot_dimension_numbers<[1], [0], [0], [1], [0, 0, 1, 1], [], []>} : vector<16x256xbf16>, vector<256x64xbf16>, vector<16x64xf32> -> vector<16x64xf32>
    %327 = vector.shape_cast %204 : vector<64xf32> to vector<1x64xf32>
    %328 = vector.broadcast %327 : vector<1x64xf32> to vector<16x64xf32>
    %329 = arith.addf %326, %328 : vector<16x64xf32>
    %330 = arith.addf %276, %329 : vector<16x64xf32>
    %c18 = arith.constant 18 : index
    %c0_112 = arith.constant 0 : index
    %331 = vector.load %arg6[%c18, %c0_112] : memref<20x64xf32, #tpu.memory_space<vmem>>, vector<1x64xf32>
    %332 = vector.shape_cast %331 : vector<1x64xf32> to vector<64xf32>
    %c19 = arith.constant 19 : index
    %c0_113 = arith.constant 0 : index
    %333 = vector.load %arg6[%c19, %c0_113] : memref<20x64xf32, #tpu.memory_space<vmem>>, vector<1x64xf32>
    %334 = vector.shape_cast %333 : vector<1x64xf32> to vector<64xf32>
    %335 = vector.extract_strided_slice %330 {offsets = [7, 0], sizes = [1, 64], strides = [1, 1]} : vector<16x64xf32> to vector<1x64xf32>
    %336 = vector.extract_strided_slice %330 {offsets = [15, 0], sizes = [1, 64], strides = [1, 1]} : vector<16x64xf32> to vector<1x64xf32>
    %337 = tpu.concatenate %335, %336 in 0 : vector<1x64xf32>, vector<1x64xf32> -> vector<2x64xf32>
    %cst_114 = arith.constant dense<0.000000e+00> : vector<2xf32>
    %338 = vector.multi_reduction <add>, %337, %cst_114 [1] : vector<2x64xf32> to vector<2xf32>
    %339 = vector.shape_cast %338 : vector<2xf32> to vector<2x1xf32>
    %cst_115 = arith.constant 6.400000e+01 : f32
    %340 = vector.broadcast %cst_115 : f32 to vector<2x1xf32>
    %341 = arith.divf %339, %340 : vector<2x1xf32>
    %342 = arith.mulf %337, %337 : vector<2x64xf32>
    %cst_116 = arith.constant dense<0.000000e+00> : vector<2xf32>
    %343 = vector.multi_reduction <add>, %342, %cst_116 [1] : vector<2x64xf32> to vector<2xf32>
    %344 = vector.shape_cast %343 : vector<2xf32> to vector<2x1xf32>
    %cst_117 = arith.constant 6.400000e+01 : f32
    %345 = vector.broadcast %cst_117 : f32 to vector<2x1xf32>
    %346 = arith.divf %344, %345 : vector<2x1xf32>
    %347 = arith.mulf %341, %341 : vector<2x1xf32>
    %348 = arith.subf %346, %347 : vector<2x1xf32>
    %349 = vector.broadcast %341 : vector<2x1xf32> to vector<2x64xf32>
    %350 = arith.subf %337, %349 : vector<2x64xf32>
    %cst_118 = arith.constant 9.99999974E-6 : f32
    %351 = vector.broadcast %cst_118 : f32 to vector<2x1xf32>
    %352 = arith.addf %348, %351 : vector<2x1xf32>
    %353 = math.rsqrt %352 : vector<2x1xf32>
    %354 = vector.broadcast %353 : vector<2x1xf32> to vector<2x64xf32>
    %355 = arith.mulf %350, %354 : vector<2x64xf32>
    %356 = vector.shape_cast %332 : vector<64xf32> to vector<1x64xf32>
    %357 = vector.broadcast %356 : vector<1x64xf32> to vector<2x64xf32>
    %358 = arith.mulf %355, %357 : vector<2x64xf32>
    %359 = vector.shape_cast %334 : vector<64xf32> to vector<1x64xf32>
    %360 = vector.broadcast %359 : vector<1x64xf32> to vector<2x64xf32>
    %361 = arith.addf %358, %360 : vector<2x64xf32>
    %c0_119 = arith.constant 0 : index
    %c0_120 = arith.constant 0 : index
    %362 = vector.load %arg8[%c0_119, %c0_120] : memref<2x64xf32, #tpu.memory_space<vmem>>, vector<2x64xf32>
    tpu.vector_store %arg8[%c0_119, %c0_120], %361 {strides = array<i32>} : memref<2x64xf32, #tpu.memory_space<vmem>>, vector<2x64xf32>,
    return
  }
}

</mosaic_0001>

<bundles_post_ra>
// kernel: tpu_custom_call.1
= control target key start
LH: loop header
LB: loop body
LE: loop exit
PB: predicated region body
PF: predicated region fallthrough
CT: control target
= control target key end

     0   :  { %vm3492_vm0 = vcmask 523264   ;;  %v2621_v16 = vmov 0   ;;  %s3481_s0 = inlined_call_operand.vmem [shape: f32[2,8,64], index: 0, kind: input, shape index: {}]   ;;  %s3482_s1 = inlined_call_operand.vmem [shape: f32[8,64], index: 1, kind: input, shape index: {}]   ;;  %s3483_s2 = inlined_call_operand.vmem [shape: bf16[2,64,192], index: 2, kind: input, shape index: {}]   ;;  %s3484_s3 = inlined_call_operand.vmem [shape: bf16[2,64,64], index: 3, kind: input, shape index: {}]   ;;  %s3485_s4 = inlined_call_operand.vmem [shape: bf16[2,64,256], index: 4, kind: input, shape index: {}]   ;;  %s3486_s5 = inlined_call_operand.vmem [shape: bf16[2,256,64], index: 5, kind: input, shape index: {}]   ;;  %s3487_s6 = inlined_call_operand.vmem [shape: f32[20,64], index: 6, kind: input, shape index: {}]   ;;  %s3488_s7 = inlined_call_operand.vmem [shape: f32[2,256], index: 7, kind: input, shape index: {}]   ;;  %s3489_s8 = inlined_call_operand.hbm [shape: f32[2,64], index: 8, kind: output, shape index: {}]  }
   0x1   :  { %v89_v0 = vld [vmem:[%s3481_s0] sm:$0xff]  ;;  %v90_v2 = vld [vmem:[%s3481_s0 + $0x8] sm:$0xff]  ;;  %v2461_v11 = vld [vmem:[%s3483_s2 + $0x34] ss:$8 sps:$4 sm:$0xff]   ;;  %231 = vmatprep.mubr.bf16.mxu0 %v2621_v16 }
   0x2   :  { %v91_v1 = vld [vmem:[%s3482_s1] sm:$0xff]  ;;  %v2463_v12 = vld [vmem:[%s3483_s2 + $0x30] ss:$8 sps:$4 sm:$0xff]   ;;  %207 = vmatprep.subr.bf16.mxu0 %v2461_v11  ;;  %v2467_v15 = vld [vmem:[%s3483_s2 + $0x14] ss:$8 sps:$4 sm:$0xff]  }
   0x3   :  { %v2682_v3 = vadd.f32 %v91_v1, %v89_v0  ;;  %v2684_v4 = vadd.f32 %v91_v1, %v90_v2  ;;  %v2464_v13 = vld [vmem:[%s3483_s2 + $0x24] ss:$8 sps:$4 sm:$0xff]   ;;  %208 = vmatpush1.bf16.msra.mxu0 %v2463_v12  ;;  %v2466_v14 = vld [vmem:[%s3483_s2 + $0x20] ss:$8 sps:$4 sm:$0xff]   ;;  %v2469_v17 = vld [vmem:[%s3483_s2 + $0x10] ss:$8 sps:$4 sm:$0xff]  }
   0x4   :  { %209 = vmatprep.subr.bf16.mxu0 %v2464_v13  ;;  %v2470_v18 = vld [vmem:[%s3483_s2 + $0x4] ss:$8 sps:$4 sm:$0xff]   ;;  %v2472_v19 = vld [vmem:[%s3483_s2] ss:$8 sps:$4 sm:$0xff]  }
   0x5   :  { %v104_v5 = vsel %vm3492_vm0, %v2682_v3, 0.0  ;;  %v113_v6 = vmul.f32 %v2682_v3, %v2682_v3  ;;  %v114_v7 = vmul.f32 %v2684_v4, %v2684_v4  ;;  %v107_v9 = vsel %vm3492_vm0, %v2684_v4, 0.0 }
   0x6   :  { %105 = vadd.xlane.f32.xlu0 %v104_v5 }
   0x7   :  { %v115_v8 = vsel %vm3492_vm0, %v113_v6, 0.0  ;;  %v118_v10 = vsel %vm3492_vm0, %v114_v7, 0.0  ;;  %210 = vmatpush1.bf16.msra.mxu0 %v2466_v14 }
   0x8   :  { %116 = vadd.xlane.f32.xlu1 %v115_v8  ;;  %211 = vmatprep.subr.bf16.mxu0 %v2467_v15 }
   0xa   :  { %108 = vadd.xlane.f32.xlu0 %v107_v9 }
   0xb   :  { %212 = vmatpush1.bf16.msra.mxu0 %v2469_v17 }
   0xc   :  { %119 = vadd.xlane.f32.xlu1 %v118_v10  ;;  %213 = vmatprep.subr.bf16.mxu0 %v2470_v18 }
   0xf   :  { %214 = vmatpush1.bf16.msra.mxu0 %v2472_v19 }
  0x10   :  { %13 = vsyncpa [#allocation3], 0  ;;  %v2027_v20 = vld [vmem:[%s3487_s6 + $0x5] ss:$0 sm:$0xff]  ;;  %s2622_s27 = smov 64   ;;  %v2623_v48 = vmov 0.0   ;;  %v31_v60 = vlaneseq }
  0x11   :  { %v2015_v38 = vld [vmem:[%s3487_s6] ss:$0 sm:$0xff]  ;;  %v2016_v43 = vld [vmem:[%s3487_s6 + $0x1] ss:$0 sm:$0xff]  ;;  %2324 = vmatprep.subr.bf16.mxu1 %v2623_v48  ;;  %v2026_v50 = vld [vmem:[%s3487_s6 + $0x4] ss:$0 sm:$0xff] }
  0x12   :  { %vm3490_vm1 = vmmov 0   ;;  %v2746_v61 = vshrl.u32 %v31_v60, 7  ;;  %v2754_v0 = vand.u32 127, %v31_v60  ;;  %v2517_v9 = vld [vmem:[%s3484_s3 + $0x38] sm:$0xff]   ;;  %v2518_v10 = vld [vmem:[%s3484_s3 + $0x30] sm:$0xff]   ;;  %s2627_s23 = smov [#allocation2]  }
  0x13   :  { %2332 = vmatprep.mubr.msk.bf16.mxu1 %vm3490_vm1, %v2623_v48  ;;  %s2007_s24 = sshll.u32 %s2627_s23, 4  ;;  %s2008_s24 = int_to_ptr.vmem [resolvable:$true] %s2007_s24 }
  0x14   :  { %v2749_v62 = vadd.s32 48, %v2746_v61  ;;  %v2752_v63 = vadd.s32 56, %v2746_v61  ;;  %v2757_v1 = vadd.s32 32, %v2746_v61  ;;  %v2762_v6 = vshra.s32 %v2754_v0, 4  ;;  %s2599_s25 = scalar_lea.vmem %s2008_s24, 32  ;;  %p2604_p1 = scmp.lt.s32.totalorder %s2008_s24, %s2008_s24 }
  0x15   :  { %v2765_v7 = vadd.s32 40, %v2746_v61  ;;  %v2788_v18 = vadd.s32 16, %v2746_v61  ;;  %p2600_p0 = scmp.ne.s32.totalorder %s2008_s24, %s2599_s25  ;;  %p2605_p2 = scmp.lt.s32.totalorder %s2599_s25, %s2599_s25 }
  0x16   :  { %v46_v2 = vshra.s32 %v2749_v62, 4  ;;  %v47_v5 = vshra.s32 %v2752_v63, 4  ;;  %v44_v11 = vshra.s32 %v2757_v1, 4  ;;  %v3531_v62 = vmov 0 }
  0x17   :  { %v45_v12 = vshra.s32 %v2765_v7, 4  ;;  %v3535_v1 = vmov 0  ;;  %p2606_p3 = por %p2605_p2, %p2604_p1 }
  0x18   :  { %vm2770_vm2 = vcmp.eq.s32.totalorder %v46_v2, %v2762_v6  ;;  %vm2777_vm3 = vcmp.eq.s32.totalorder %v47_v5, %v2762_v6  ;;  %vm2793_vm4 = vcmp.eq.s32.totalorder %v44_v11, %v2762_v6 }
  0x19   :  { %vm2800_vm5 = vcmp.eq.s32.totalorder %v45_v12, %v2762_v6  ;;  %p2607_p4 = pnand %p2606_p3, %p2600_p0 }
  0x20   :  { %253 = vrot.lane.b32.xlu0 %v2027_v20, %s2622_s27 }
  0x8f   :  { %v106_v21 = vpop.xlane.xlu0 %105 }
  0x90   :  { %v111_v22 = vmul.f32 0.015625, %v106_v21 }
  0x91   :  { %v117_v23 = vpop.xlane.xlu1 %116 }
  0x92   :  { %v123_v24 = vmul.f32 %v111_v22, %v111_v22  ;;  %v121_v25 = vmul.f32 0.015625, %v117_v23  ;;  %v127_v35 = vsub.f32 %v2682_v3, %v111_v22  ;;  %v2805_v22 = vadd.s32 24, %v2746_v61 }
  0x93   :  { %v109_v26 = vpop.xlane.xlu0 %108 }
  0x94   :  { %v125_v27 = vsub.f32 %v121_v25, %v123_v24  ;;  %v112_v28 = vmul.f32 0.015625, %v109_v26  ;;  %v42_v26 = vshra.s32 %v2788_v18, 4 }
  0x95   :  { %v120_v29 = vpop.xlane.xlu1 %119 }
  0x96   :  { %v129_v30 = vadd.f32 1e-05, %v125_v27  ;;  %v124_v31 = vmul.f32 %v112_v28, %v112_v28  ;;  %v122_v32 = vmul.f32 0.015625, %v120_v29  ;;  %v128_v39 = vsub.f32 %v2684_v4, %v112_v28 }
  0x97   :  { %v254_v51 = vpop.permute.xlu0 %253  ;;  %v43_v27 = vshra.s32 %v2805_v22, 4  ;;  %vm2818_vm6 = vcmp.eq.s32.totalorder %v42_v26, %v2762_v6 }
  0x98   :  { %2549 = vrsqrt.f32 %v129_v30  ;;  %v126_v33 = vsub.f32 %v122_v32, %v124_v31  ;;  %v2828_v31 = vadd.s32 8, %v2746_v61 }
  0x99   :  { %vm2823_vm7 = vcmp.eq.s32.totalorder %v43_v27, %v2762_v6 }
  0x9a   :  { %v130_v34 = vadd.f32 1e-05, %v126_v33 }
  0x9c   :  { %2551 = vrsqrt.f32 %v130_v34 }
  0xa5   :  { %v2550_v36 = vpop.eup %2549 }
  0xa6   :  { %v133_v37 = vmul.f32 %v2550_v36, %v127_v35  ;;  %v40_v35 = vshra.s32 %v2746_v61, 4  ;;  %v41_v36 = vshra.s32 %v2828_v31, 4 }
  0xa8   :  { %v139_v42 = vmul.f32 %v2015_v38, %v133_v37  ;;  %vm2839_vm8 = vcmp.eq.s32.totalorder %v40_v35, %v2762_v6  ;;  %vm2844_vm9 = vcmp.eq.s32.totalorder %v41_v36, %v2762_v6  ;;  %vm2941_vm1 = vcmp.eq.s32.totalorder %v41_v36, %v2754_v0 }
  0xa9   :  { %v2552_v40 = vpop.eup %2551 }
  0xaa   :  { %v134_v41 = vmul.f32 %v2552_v40, %v128_v39  ;;  %v145_v45 = vadd.f32 %v2016_v43, %v139_v42  ;;  %v3523_v39 = vmov 0 }
  0xab   :  { %v3524_v39 = vsel %vm2844_vm9, 4294967295, %v3523_v39 }
  0xac   :  { %v140_v44 = vmul.f32 %v2015_v38, %v134_v41 }
  0xae   :  { %v146_v46 = vadd.f32 %v2016_v43, %v140_v44 }
  0xb0   :  { %v147_v47 = vpack.c.bf16 %v146_v46, %v145_v45  ;;  %v59_v45 = vand.u32 15, %v2754_v0  ;;  %v60_v46 = vshra.s32 %v2746_v61, 3 }
  0xb2   :  { %2025 = vmatmul.mubr.msk.bf16.vlgmr.msra.gmra.mxu0 %vm3492_vm0, %v147_v47  ;;  %v62_v47 = vshra.s32 %v59_v45, 3  ;;  %vm65_vm11 = vcmp.le.s32.totalorder %v59_v45, %v2746_v61  ;;  %vm66_vm14 = vcmp.le.s32.totalorder %v59_v45, %v2828_v31  ;;  %v2475_v45 = vld [vmem:[%s3484_s3 + $0x8] sm:$0xff]  }
  0xb4   :  { %vm63_vm10 = vcmp.eq.s32.totalorder %v60_v46, %v62_v47  ;;  %v2476_v46 = vld [vmem:[%s3484_s3] sm:$0xff]  }
  0xb5   :  { %vm67_vm12 = vmand %vm63_vm10, %vm65_vm11  ;;  %vm2873_vm10 = vcmp.eq.s32.totalorder %v47_v5, %v2754_v0  ;;  %vm2883_vm11 = vcmp.eq.s32.totalorder %v46_v2, %v2754_v0  ;;  %v3533_v2 = vmov 0  ;;  %v3537_v5 = vmov 0 }
  0xb6   :  { %v3538_v5 = vsel %vm2941_vm1, 4294967295, %v3537_v5 }
 0x172   :  { %v233_v49 = vpop.f32.mrf.mxu0 }
 0x173   :  { %v2740_v54 = vadd.f32 %v2026_v50, %v233_v49  ;;  %v256_v55 = vadd.f32 %v254_v51, %v233_v49  ;;  %v61_v49 = vshra.s32 %v2828_v31, 3 }
 0x174   :  { %v2738_v52 = vpop.f32.mrf.mxu0 }
 0x175   :  { %vm64_vm13 = vcmp.eq.s32.totalorder %v61_v49, %v62_v47 }
 0x176   :  { %v237_v53 = vpop.f32.mrf.mxu0  ;;  %vm68_vm15 = vmand %vm64_vm13, %vm66_vm14  ;;  %vm2906_vm13 = vcmp.eq.s32.totalorder %v44_v11, %v2754_v0  ;;  %vm2917_vm14 = vcmp.eq.s32.totalorder %v43_v27, %v2754_v0 }
 0x177   :  { %v247_v56 = vadd.f32 %v2026_v50, %v237_v53  ;;  %v257_v57 = vadd.f32 %v254_v51, %v237_v53  ;;  %v2625_v51 = vmov -1e+30   ;;  %v3532_v62 = vsel %vm2906_vm13, 4294967295, %v3531_v62 }
 0x178   :  { %v2862_v53 = vsel %vm67_vm12, 0.0, %v2625_v51  ;;  %vm2893_vm12 = vcmp.eq.s32.totalorder %v45_v12, %v2754_v0  ;;  %v3534_v2 = vsel %vm2917_vm14, 4294967295, %v3533_v2  ;;  %v239_v27 = vpop.f32.mrf.mxu0 }
 0x179   :  { %v284_v58 = vpack.c.bf16 %v247_v56, %v2740_v54  ;;  %v2451_v59 = vpack.i.bf16 %v257_v57, %v256_v55 }
 0x17b   :  { %2452 = vrot.lane.b32.xlu1 %v2451_v59, %s2622_s27 }
 0x1ed   :  { %v2453_v8 = vpop.permute.xlu1 %2452 }
 0x1ee   :  { %v2455_v13 = vunpack.i.h.bf16 %v2453_v8  ;;  %v2454_v14 = vunpack.i.l.bf16 %v2453_v8 }
 0x1f0   :  { %v278_v15 = vsel %vm2770_vm2, %v2454_v14, 0.0  ;;  %v279_v17 = vsel %vm2777_vm3, %v2455_v13, 0.0  ;;  %v276_v24 = vsel %vm2793_vm4, %v2454_v14, 0.0  ;;  %v277_v25 = vsel %vm2800_vm5, %v2455_v13, 0.0 }
 0x1f1   :  { %v283_v19 = vpack.c.bf16 %v279_v17, %v278_v15  ;;  %v282_v28 = vpack.c.bf16 %v277_v25, %v276_v24  ;;  %v274_v33 = vsel %vm2818_vm6, %v2454_v14, 0.0  ;;  %v275_v34 = vsel %vm2823_vm7, %v2455_v13, 0.0 }
 0x1f2   :  { %v281_v37 = vpack.c.bf16 %v275_v34, %v274_v33  ;;  %v272_v41 = vsel %vm2839_vm8, %v2454_v14, 0.0  ;;  %v273_v42 = vsel %vm2844_vm9, %v2455_v13, 0.0  ;;  %v2626_v17 = vmov 1.0  }
 0x1f3   :  { %v298_v23 = vsel %vm3492_vm0, %v283_v19, 0  ;;  %v295_v32 = vsel %vm3492_vm0, %v282_v28, 0  ;;  %v280_v43 = vpack.c.bf16 %v273_v42, %v272_v41  ;;  %2336 = vmatprep.subr.msk.mxu0 %vm2873_vm10, %v2626_v17  ;;  %v2473_v42 = vld [vmem:[%s3484_s3 + $0x18] sm:$0xff]   ;;  %v2073_v19 = vld [vmem:[%s3487_s6 + $0x8] ss:$0 sm:$0xff] }
 0x1f4   :  { %2325 = vmatpush3.bf16.xpose.msra.mxu1 %v298_v23  ;;  %v292_v40 = vsel %vm3492_vm0, %v281_v37, 0  ;;  %2337 = vmatpush3.msk.msra.mxu0 %vm2873_vm10, %v2626_v17 }
 0x1f5   :  { %2326 = vmatprep.subr.bf16.mxu1 %v2623_v48  ;;  %v289_v44 = vsel %vm3492_vm0, %v280_v43, 0  ;;  %2338 = vmatprep.subr.msk.mxu0 %vm2883_vm11, %v2626_v17 }
 0x1f6   :  { %2339 = vmatpush3.msk.msra.mxu0 %vm2883_vm11, %v2626_v17 }
 0x1f7   :  { %2340 = vmatprep.subr.msk.mxu0 %vm2893_vm12, %v2626_v17 }
 0x1f8   :  { %2341 = vmatpush3.msk.msra.mxu0 %vm2893_vm12, %v2626_v17 }
 0x1f9   :  { %2342 = vmatprep.subr.msk.mxu0 %vm2906_vm13, %v2626_v17 }
 0x1fa   :  { %2343 = vmatpush3.msk.msra.mxu0 %vm2906_vm13, %v2626_v17  ;;  %vm3501_vm13 = vcmask 1043456  }
 0x1fb   :  { %2344 = vmatprep.subr.msk.mxu0 %vm2917_vm14, %v2626_v17 }
 0x1fc   :  { %2327 = vmatpush3.bf16.xpose.msra.mxu1 %v295_v32  ;;  %2345 = vmatpush3.msk.msra.mxu0 %vm2917_vm14, %v2626_v17  ;;  %vm87_vm14 = vcmp.eq.s32.totalorder %v2762_v6, %v2746_v61  ;;  %v2028_v6 = vld [vmem:[%s3487_s6 + $0x6] ss:$0 sm:$0xff] }
 0x1fd   :  { %2328 = vmatprep.subr.bf16.mxu1 %v2623_v48  ;;  %v263_v32 = vadd.f32 %v2028_v6, %v239_v27  ;;  %v262_v33 = vadd.f32 %v2028_v6, %v2738_v52  ;;  %v2480_v27 = vld [vmem:[%s3485_s4 + $0x20] ss:$8 sps:$4 sm:$0xff]   ;;  %v2488_v6 = vld [vmem:[%s3485_s4 + $0x4] ss:$8 sps:$4 sm:$0xff]  }
 0x1ff   :  { %v2044_v36 = vpack.c.bf16 %v263_v32, %v262_v33  ;;  %v2486_v32 = vld [vmem:[%s3485_s4] ss:$8 sps:$4 sm:$0xff]  }
 0x204   :  { %2329 = vmatpush3.bf16.xpose.msra.mxu1 %v292_v40 }
 0x205   :  { %2330 = vmatprep.subr.bf16.mxu1 %v2623_v48 }
 0x20c   :  { %2331 = vmatpush3.bf16.xpose.msra.mxu1 %v289_v44  ;;  %v2474_v44 = vld [vmem:[%s3484_s3 + $0x10] sm:$0xff]  }
 0x213   :  { %2333 = vmatmul.mubr.msk.bf16.vlgmr.msra.gmra.mxu1 %vm3492_vm0, %v284_v58  ;;  %v2865_v58 = vsel %vm68_vm15, 0.0, %v2625_v51  ;;  %vm2930_vm15 = vcmp.eq.s32.totalorder %v42_v26, %v2754_v0  ;;  %v2973_v26 = vsel %vm87_vm14, 1.0, %v2623_v48  ;;  %vm3502_vm14 = vmpackc.low %vm2777_vm3, %vm2770_vm2 }
 0x214   :  { %806 = vmatprep.mubr.bf16.mxu1 %v2621_v16  ;;  %v3536_v1 = vsel %vm2930_vm15, 4294967295, %v3535_v1  ;;  %2346 = vmatprep.subr.msk.mxu0 %vm2930_vm15, %v2626_v17 }
 0x215   :  { %2347 = vmatpush3.msk.msra.mxu0 %vm2930_vm15, %v2626_v17  ;;  %vm3541_vm15 = vcmask 523264  }
 0x216   :  { %2348 = vmatprep.subr.msk.mxu0 %vm2941_vm1, %v2626_v17 }
 0x217   :  { %2349 = vmatpush3.msk.msra.mxu0 %vm2941_vm1, %v2626_v17  ;;  %vm3542_vm1 = vmmov %vm3541_vm15 }
 0x2d3   :  { %v334_v50 = vpop.f32.mrf.mxu1 }
 0x2d4   :  { %v341_v54 = vmul.f32 0.25, %v334_v50 }
 0x2d5   :  { %v2334_v55 = vpop.f32.mrf.mxu1 }
 0x2d6   :  { %v343_v56 = vadd.f32 %v341_v54, %v2862_v53  ;;  %v2056_v55 = vld [vmem:[%s3487_s6 + $0x7] ss:$0 sm:$0xff] }
 0x2d7   :  { %v337_v57 = vpop.f32.mrf.mxu1 }
 0x2d8   :  { %v342_v59 = vmul.f32 0.25, %v337_v57  ;;  %v345_v60 = vsel %vm3492_vm0, %v343_v56, -inf }
 0x2d9   :  { %346 = vmax.xlane.f32.xlu1 %v345_v60  ;;  %v2335_v8 = vpop.f32.mrf.mxu1 }
 0x2da   :  { %v344_v13 = vadd.f32 %v342_v59, %v2865_v58 }
 0x2dc   :  { %v348_v14 = vsel %vm3492_vm0, %v344_v13, -inf  ;;  %vm2952_vm0 = vcmp.eq.s32.totalorder %v40_v35, %v2754_v0 }
 0x2dd   :  { %349 = vmax.xlane.f32.xlu0 %v348_v14  ;;  %2350 = vmatprep.subr.msk.mxu0 %vm2952_vm0, %v2626_v17 }
 0x2de   :  { %2351 = vmatpush3.msk.msra.mxu0 %vm2952_vm0, %v2626_v17 }
 0x2df   :  { %2355 = vmatprep.subr.msk.mxu0 %vm3501_vm13, %v2973_v26 }
 0x362   :  { %v347_v0 = vpop.xlane.xlu1 %346 }
 0x363   :  { %v351_v11 = vsub.f32 %v343_v56, %v347_v0 }
 0x365   :  { %v353_v12 = vmul.f32 1.442695, %v351_v11 }
 0x366   :  { %v350_v18 = vpop.xlane.xlu0 %349 }
 0x367   :  { %2553 = vpow2.f32 %v353_v12  ;;  %v352_v22 = vsub.f32 %v344_v13, %v350_v18 }
 0x369   :  { %v355_v23 = vmul.f32 1.442695, %v352_v22 }
 0x36b   :  { %2555 = vpow2.f32 %v355_v23 }
 0x374   :  { %v2554_v24 = vpop.eup %2553 }
 0x375   :  { %2352 = vmatprep.mubr.msk.f32.mxu0 %vm3541_vm15, %v2554_v24  ;;  %vm3543_vm15 = vmmov 0  }
 0x378   :  { %v2556_v25 = vpop.eup %2555 }
 0x379   :  { %2353 = vmatmul.mubr.msk.f32.vlgmr.msra.gmra.mxu0 %vm3542_vm1, %v2556_v25  ;;  %vm3506_vm1 = vcmask 31744  }
 0x37a   :  { %2356 = vmatpush3.msk.msra.mxu0 %vm3501_vm13, %v2973_v26  ;;  %vm3503_vm13 = vmpackc.low %vm2800_vm5, %vm2793_vm4 }
 0x37b   :  { %2360 = vmatprep.subr.bf16.mxu0 %v2623_v48 }
 0x439   :  { %v2354_v28 = vpop.f32.mrf.mxu0 }
 0x43b   :  { %v429_v31 = vpop.f32.mrf.mxu0 }
 0x43c   :  { %2557 = vrcp.f32 %v429_v31  ;;  %v2485_v31 = vld [vmem:[%s3485_s4 + $0x14] ss:$8 sps:$4 sm:$0xff]  }
 0x43d   :  { %2559 = vrcp.f32 %v2354_v28  ;;  %v2483_v28 = vld [vmem:[%s3485_s4 + $0x10] ss:$8 sps:$4 sm:$0xff]  }
 0x449   :  { %v2558_v34 = vpop.eup %2557 }
 0x44a   :  { %v2560_v35 = vpop.eup %2559  ;;  %2357 = vmatprep.mubr.msk.f32.mxu0 %vm3506_vm1, %v2558_v34 }
 0x44b   :  { %2358 = vmatmul.mubr.msk.f32.vlgmr.msra.gmra.mxu0 %vm3506_vm1, %v2560_v35 }
 0x44c   :  { %2361 = vmatpush3.bf16.msk.msra.mxu0 %vm3502_vm14, %v2044_v36  ;;  %2368 = vmatprep.mubr.msk.bf16.mxu0 %vm3543_vm15, %v2623_v48  ;;  %vm3504_vm14 = vmpackc.low %vm2823_vm7, %vm2818_vm6 }
 0x44d   :  { %2362 = vmatprep.subr.bf16.mxu0 %v2623_v48 }
 0x450   :  { %2363 = vmatpush3.bf16.msk.msra.mxu0 %vm3503_vm13, %v2044_v36  ;;  %vm3505_vm13 = vmpackc.low %vm2844_vm9, %vm2839_vm8 }
 0x451   :  { %2364 = vmatprep.subr.bf16.mxu0 %v2623_v48 }
 0x454   :  { %2365 = vmatpush3.bf16.msk.msra.mxu0 %vm3504_vm14, %v2044_v36  ;;  %vm3544_vm14 = vcmask 523264  }
 0x455   :  { %2366 = vmatprep.subr.bf16.mxu0 %v2623_v48 }
 0x458   :  { %2367 = vmatpush3.bf16.msk.msra.mxu0 %vm3505_vm13, %v2044_v36  ;;  %vm3545_vm13 = vmmov %vm3544_vm14 }
 0x459   :  { %2372 = vmatprep.subr.bf16.mxu0 %v2623_v48  ;;  %vm3547_vm1 = vmmov %vm3545_vm13 }
 0x45a   :  { %vm3548_vm9 = vmmov %vm3547_vm1 }
 0x50b   :  { %v2359_v52 = vpop.f32.mrf.mxu0 }
 0x50c   :  { %v527_v40 = vmul.f32 %v2556_v25, %v2359_v52  ;;  %v2482_v25 = vld [vmem:[%s3485_s4 + $0x24] ss:$8 sps:$4 sm:$0xff]  }
 0x50d   :  { %v517_v37 = vpop.f32.mrf.mxu0 }
 0x50e   :  { %v526_v41 = vmul.f32 %v2554_v24, %v517_v37  ;;  %v2479_v24 = vld [vmem:[%s3485_s4 + $0x34] ss:$8 sps:$4 sm:$0xff]  }
 0x50f   :  { %782 = vmatprep.subr.bf16.mxu1 %v2479_v24  ;;  %v2493_v24 = vld [vmem:[%s3486_s5 + $0x68] sm:$0xff]  }
 0x510   :  { %v540_v43 = vpack.c.bf16 %v527_v40, %v526_v41 }
 0x512   :  { %2369 = vmatmul.mubr.msk.bf16.vlgmr.msra.gmra.mxu0 %vm3544_vm14, %v540_v43 }
 0x513   :  { %2373 = vmatpush3.bf16.msra.mxu0 %v2473_v42  ;;  %2380 = vmatprep.mubr.msk.bf16.mxu0 %vm3543_vm15, %v2623_v48 }
 0x514   :  { %2374 = vmatprep.subr.bf16.mxu0 %v2623_v48 }
 0x517   :  { %2375 = vmatpush3.bf16.msra.mxu0 %v2474_v44 }
 0x518   :  { %2376 = vmatprep.subr.bf16.mxu0 %v2623_v48 }
 0x51b   :  { %2377 = vmatpush3.bf16.msra.mxu0 %v2475_v45 }
 0x51c   :  { %2378 = vmatprep.subr.bf16.mxu0 %v2623_v48 }
 0x51f   :  { %2379 = vmatpush3.bf16.msra.mxu0 %v2476_v46 }
 0x5d2   :  { %v578_v47 = vpop.f32.mrf.mxu0 }
 0x5d4   :  { %v2370_v49 = vpop.f32.mrf.mxu0 }
 0x5d6   :  { %v581_v50 = vpop.f32.mrf.mxu0 }
 0x5d7   :  { %v585_v51 = vpack.c.bf16 %v581_v50, %v578_v47 }
 0x5d8   :  { %v2371_v54 = vpop.f32.mrf.mxu0 }
 0x5d9   :  { %2381 = vmatmul.mubr.msk.bf16.vlgmr.msra.gmra.mxu0 %vm3544_vm14, %v585_v51  ;;  %vm3546_vm14 = vmmov %vm3545_vm13  ;;  %v2062_v54 = vld [vmem:[%s3487_s6 + $0x2] ss:$0 sm:$0xff] }
 0x699   :  { %v659_v56 = vpop.f32.mrf.mxu0 }
 0x69a   :  { %v660_v57 = vadd.f32 %v2056_v55, %v659_v56 }
 0x69b   :  { %v2382_v59 = vpop.f32.mrf.mxu0 }
 0x69c   :  { %v3051_v60 = vadd.f32 %v660_v57, %v2682_v3 }
 0x69d   :  { %v662_v8 = vpop.f32.mrf.mxu0 }
 0x69e   :  { %v663_v13 = vadd.f32 %v2056_v55, %v662_v8  ;;  %v668_v14 = vsel %vm3545_vm13, %v3051_v60, 0.0  ;;  %v676_v0 = vmul.f32 %v3051_v60, %v3051_v60  ;;  %v2063_v8 = vld [vmem:[%s3487_s6 + $0x3] ss:$0 sm:$0xff]  ;;  %vm3550_vm13 = vnez %v3532_v62 }
 0x69f   :  { %669 = vadd.xlane.f32.xlu0 %v668_v14  ;;  %v2383_v11 = vpop.f32.mrf.mxu0 }
 0x6a0   :  { %v3058_v12 = vadd.f32 %v663_v13, %v2684_v4  ;;  %v678_v18 = vsel %vm3546_vm14, %v676_v0, 0.0  ;;  %v2477_v4 = vld [vmem:[%s3485_s4 + $0x30] ss:$8 sps:$4 sm:$0xff]  }
 0x6a1   :  { %783 = vmatpush1.bf16.msra.mxu1 %v2477_v4  ;;  %v2494_v4 = vld [vmem:[%s3486_s5 + $0x28] sm:$0xff]  }
 0x6a2   :  { %v671_v22 = vsel %vm3547_vm1, %v3058_v12, 0.0  ;;  %v677_v3 = vmul.f32 %v3058_v12, %v3058_v12  ;;  %784 = vmatprep.subr.bf16.mxu1 %v2482_v25  ;;  %v2495_v25 = vld [vmem:[%s3486_s5 + $0x60] sm:$0xff]  }
 0x6a3   :  { %679 = vadd.xlane.f32.xlu0 %v678_v18  ;;  %672 = vadd.xlane.f32.xlu1 %v671_v22  ;;  %v2489_v18 = vld [vmem:[%s3486_s5 + $0x78] sm:$0xff]  }
 0x6a4   :  { %v681_v23 = vsel %vm3548_vm9, %v677_v3, 0.0  ;;  %vm3549_vm9 = vmmov %vm3547_vm1  ;;  %v2490_v22 = vld [vmem:[%s3486_s5 + $0x38] sm:$0xff]   ;;  %2252 = vmatprep.subr.bf16.mxu0 %v2489_v18  ;;  %v2491_v3 = vld [vmem:[%s3486_s5 + $0x70] sm:$0xff]   ;;  %vm3554_vm1 = vcmask 1043456  }
 0x6a5   :  { %785 = vmatpush1.bf16.msra.mxu1 %v2480_v27  ;;  %2253 = vmatpush3.bf16.msra.mxu0 %v2490_v22  ;;  %v2496_v27 = vld [vmem:[%s3486_s5 + $0x20] sm:$0xff]  }
 0x6a6   :  { %786 = vmatprep.subr.bf16.mxu1 %v2485_v31  ;;  %2254 = vmatprep.subr.bf16.mxu0 %v2491_v3  ;;  %v2498_v31 = vld [vmem:[%s3486_s5 + $0x18] sm:$0xff]  }
 0x6a7   :  { %682 = vadd.xlane.f32.xlu1 %v681_v23  ;;  %v2492_v23 = vld [vmem:[%s3486_s5 + $0x30] sm:$0xff]  }
 0x6a9   :  { %787 = vmatpush1.bf16.msra.mxu1 %v2483_v28  ;;  %2255 = vmatpush3.bf16.msra.mxu0 %v2492_v23  ;;  %v2497_v28 = vld [vmem:[%s3486_s5 + $0x58] sm:$0xff]  }
 0x6aa   :  { %788 = vmatprep.subr.bf16.mxu1 %v2488_v6  ;;  %2256 = vmatprep.subr.bf16.mxu0 %v2493_v24  ;;  %v2499_v6 = vld [vmem:[%s3486_s5 + $0x50] sm:$0xff]  }
 0x6ad   :  { %789 = vmatpush1.bf16.msra.mxu1 %v2486_v32  ;;  %2257 = vmatpush3.bf16.msra.mxu0 %v2494_v4  ;;  %v2500_v32 = vld [vmem:[%s3486_s5 + $0x10] sm:$0xff]  }
 0x6ae   :  { %2258 = vmatprep.subr.bf16.mxu0 %v2495_v25 }
 0x6b1   :  { %2259 = vmatpush3.bf16.msra.mxu0 %v2496_v27 }
 0x6b2   :  { %2260 = vmatprep.subr.bf16.mxu0 %v2497_v28 }
 0x6b5   :  { %2261 = vmatpush3.bf16.msra.mxu0 %v2498_v31 }
 0x6b6   :  { %2262 = vmatprep.subr.bf16.mxu0 %v2499_v6 }
 0x6b9   :  { %2263 = vmatpush3.bf16.msra.mxu0 %v2500_v32 }
 0x728   :  { %v670_v33 = vpop.xlane.xlu0 %669 }
 0x729   :  { %v674_v34 = vmul.f32 0.015625, %v670_v33  ;;  %v2501_v33 = vld [vmem:[%s3486_s5 + $0x48] sm:$0xff]  }
 0x72a   :  { %2264 = vmatprep.subr.bf16.mxu0 %v2501_v33 }
 0x72b   :  { %v686_v52 = vmul.f32 %v674_v34, %v674_v34  ;;  %v690_v49 = vsub.f32 %v3051_v60, %v674_v34  ;;  %v2502_v34 = vld [vmem:[%s3486_s5 + $0x8] sm:$0xff]  }
 0x72c   :  { %v680_v35 = vpop.xlane.xlu0 %679  ;;  %v673_v36 = vpop.xlane.xlu1 %672  ;;  %2265 = vmatpush3.bf16.msra.mxu0 %v2502_v34 }
 0x72d   :  { %v684_v37 = vmul.f32 0.015625, %v680_v35  ;;  %v675_v40 = vmul.f32 0.015625, %v673_v36  ;;  %v2503_v35 = vld [vmem:[%s3486_s5 + $0x40] sm:$0xff]  }
 0x72e   :  { %v2504_v36 = vld [vmem:[%s3486_s5] sm:$0xff]   ;;  %2266 = vmatprep.subr.bf16.mxu0 %v2503_v35 }
 0x72f   :  { %v688_v41 = vsub.f32 %v684_v37, %v686_v52  ;;  %v687_v44 = vmul.f32 %v675_v40, %v675_v40  ;;  %v691_v55 = vsub.f32 %v3058_v12, %v675_v40  ;;  %v723_v52 = vsub.s32 0, %v2746_v61  ;;  %v719_v37 = vld [vmem:[%s3488_s7] ss:$2 sm:$0x3] }
 0x730   :  { %v683_v42 = vpop.xlane.xlu1 %682  ;;  %2267 = vmatpush3.bf16.msra.mxu0 %v2504_v36  ;;  %v727_v40 = vsub.s32 1, %v2746_v61 }
 0x731   :  { %v692_v43 = vadd.f32 1e-05, %v688_v41  ;;  %v685_v45 = vmul.f32 0.015625, %v683_v42  ;;  %2396 = vmatprep.subr.msk.mxu0 %vm2873_vm10, %v2626_v17  ;;  %v724_v41 = vrot.slane %v719_v37, %v723_v52 }
 0x732   :  { %v728_v42 = vrot.slane %v719_v37, %v727_v40 }
 0x733   :  { %2561 = vrsqrt.f32 %v692_v43  ;;  %v689_v46 = vsub.f32 %v685_v45, %v687_v44 }
 0x735   :  { %v693_v47 = vadd.f32 1e-05, %v689_v46 }
 0x737   :  { %2563 = vrsqrt.f32 %v693_v47 }
 0x740   :  { %v2562_v50 = vpop.eup %2561 }
 0x741   :  { %v696_v51 = vmul.f32 %v2562_v50, %v690_v49 }
 0x743   :  { %v702_v59 = vmul.f32 %v2062_v54, %v696_v51 }
 0x744   :  { %v2564_v56 = vpop.eup %2563 }
 0x745   :  { %v697_v57 = vmul.f32 %v2564_v56, %v691_v55  ;;  %v708_v14 = vadd.f32 %v2063_v8, %v702_v59 }
 0x747   :  { %v703_v13 = vmul.f32 %v2062_v54, %v697_v57 }
 0x749   :  { %v709_v0 = vadd.f32 %v2063_v8, %v703_v13 }
 0x74b   :  { %v710_v11 = vpack.c.bf16 %v709_v0, %v708_v14 }
 0x74d   :  { %2072 = vmatmul.mubr.msk.bf16.vlgmr.msra.gmra.mxu1 %vm3549_vm9, %v710_v11 }
 0x74e   :  { %1166 = vmatprep.mubr.bf16.mxu1 %v2621_v16 }
 0x80d   :  { %v808_v43 = vpop.f32.mrf.mxu1 }
 0x80e   :  { %v809_v44 = vadd.f32 %v808_v43, %v724_v41 }
 0x80f   :  { %v810_v45 = vpop.f32.mrf.mxu1 }
 0x810   :  { %v817_v46 = vmul.f32 %v809_v44, %v809_v44  ;;  %v811_v47 = vadd.f32 %v810_v45, %v728_v42 }
 0x811   :  { %v812_v49 = vpop.f32.mrf.mxu1 }
 0x812   :  { %v821_v50 = vmul.f32 %v817_v46, %v809_v44  ;;  %v818_v51 = vmul.f32 %v811_v47, %v811_v47  ;;  %v813_v54 = vadd.f32 %v812_v49, %v724_v41 }
 0x813   :  { %v814_v55 = vpop.f32.mrf.mxu1 }
 0x814   :  { %v825_v56 = vmul.f32 0.044715, %v821_v50  ;;  %v822_v57 = vmul.f32 %v818_v51, %v811_v47  ;;  %v819_v59 = vmul.f32 %v813_v54, %v813_v54  ;;  %v815_v8 = vadd.f32 %v814_v55, %v728_v42 }
 0x816   :  { %v829_v13 = vadd.f32 %v825_v56, %v809_v44  ;;  %v826_v14 = vmul.f32 0.044715, %v822_v57  ;;  %v823_v0 = vmul.f32 %v819_v59, %v813_v54  ;;  %v820_v11 = vmul.f32 %v815_v8, %v815_v8 }
 0x818   :  { %v833_v18 = vmul.f32 0.7978846, %v829_v13  ;;  %v830_v22 = vadd.f32 %v826_v14, %v811_v47  ;;  %v827_v3 = vmul.f32 0.044715, %v823_v0  ;;  %v824_v23 = vmul.f32 %v820_v11, %v815_v8  ;;  %v2507_v0 = vld [vmem:[%s3483_s2 + $0x74] ss:$8 sps:$4 sm:$0xff]  }
 0x819   :  { %1142 = vmatprep.subr.bf16.mxu1 %v2507_v0  ;;  %v2510_v11 = vld [vmem:[%s3483_s2 + $0x64] ss:$8 sps:$4 sm:$0xff]  }
 0x81a   :  { %v834_v24 = vmul.f32 0.7978846, %v830_v22  ;;  %v831_v4 = vadd.f32 %v827_v3, %v813_v54  ;;  %v828_v25 = vmul.f32 0.044715, %v824_v23  ;;  %2565 = vtanh.f32 %v833_v18  ;;  %v2508_v18 = vld [vmem:[%s3483_s2 + $0x60] ss:$8 sps:$4 sm:$0xff]  }
 0x81b   :  { %v2511_v22 = vld [vmem:[%s3483_s2 + $0x50] ss:$8 sps:$4 sm:$0xff]   ;;  %v2513_v3 = vld [vmem:[%s3483_s2 + $0x54] ss:$8 sps:$4 sm:$0xff]   ;;  %v2516_v23 = vld [vmem:[%s3483_s2 + $0x44] ss:$8 sps:$4 sm:$0xff]  }
 0x81c   :  { %2567 = vtanh.f32 %v834_v24  ;;  %v835_v27 = vmul.f32 0.7978846, %v831_v4  ;;  %v832_v28 = vadd.f32 %v828_v25, %v815_v8  ;;  %v2514_v24 = vld [vmem:[%s3483_s2 + $0x40] ss:$8 sps:$4 sm:$0xff]   ;;  %v2110_v4 = vld [vmem:[%s3487_s6 + $0xe] ss:$0 sm:$0xff] }
 0x81e   :  { %2569 = vtanh.f32 %v835_v27  ;;  %v836_v31 = vmul.f32 0.7978846, %v832_v28 }
 0x820   :  { %2571 = vtanh.f32 %v836_v31 }
 0x827   :  { %v2566_v6 = vpop.eup %2565 }
 0x828   :  { %v841_v35 = vadd.f32 1.0, %v2566_v6 }
 0x829   :  { %v2568_v32 = vpop.eup %2567 }
 0x82a   :  { %v842_v33 = vadd.f32 1.0, %v2568_v32  ;;  %v845_v45 = vmul.f32 0.5, %v841_v35 }
 0x82b   :  { %v2570_v34 = vpop.eup %2569 }
 0x82c   :  { %v843_v36 = vadd.f32 1.0, %v2570_v34  ;;  %v846_v43 = vmul.f32 0.5, %v842_v33  ;;  %v849_v55 = vmul.f32 %v845_v45, %v809_v44 }
 0x82d   :  { %v2572_v37 = vpop.eup %2571 }
 0x82e   :  { %v847_v41 = vmul.f32 0.5, %v843_v36  ;;  %v844_v42 = vadd.f32 1.0, %v2572_v37  ;;  %v850_v50 = vmul.f32 %v846_v43, %v811_v47 }
 0x830   :  { %v848_v46 = vmul.f32 0.5, %v844_v42  ;;  %v851_v49 = vmul.f32 %v847_v41, %v813_v54 }
 0x832   :  { %v852_v51 = vmul.f32 %v848_v46, %v815_v8  ;;  %v853_v57 = vpack.c.bf16 %v851_v49, %v849_v55 }
 0x834   :  { %v854_v56 = vpack.c.bf16 %v852_v51, %v850_v50  ;;  %v2090_v50 = vld [vmem:[%s3487_s6 + $0x9] ss:$0 sm:$0xff] }
 0x836   :  { %1019 = vmatprep.mubr.bf16.mxu0 %v854_v56 }
 0x837   :  { %1020 = vmatmul.mubr.bf16.vlgmr.msra.gmra.mxu0 %v853_v57 }
 0x838   :  { %2397 = vmatpush3.msk.msra.mxu0 %vm2873_vm10, %v2626_v17  ;;  %vm3551_vm10 = vnez %v3534_v2 }
 0x839   :  { %2398 = vmatprep.subr.msk.mxu0 %vm2883_vm11, %v2626_v17 }
 0x83a   :  { %2399 = vmatpush3.msk.msra.mxu0 %vm2883_vm11, %v2626_v17  ;;  %vm3552_vm11 = vnez %v3536_v1 }
 0x83b   :  { %2400 = vmatprep.subr.msk.mxu0 %vm2893_vm12, %v2626_v17 }
 0x83c   :  { %2401 = vmatpush3.msk.msra.mxu0 %vm2893_vm12, %v2626_v17  ;;  %vm3553_vm12 = vnez %v3538_v5 }
 0x83d   :  { %2402 = vmatprep.subr.msk.mxu0 %vm3550_vm13, %v2626_v17 }
 0x83e   :  { %2403 = vmatpush3.msk.msra.mxu0 %vm3550_vm13, %v2626_v17 }
 0x83f   :  { %2404 = vmatprep.subr.msk.mxu0 %vm3551_vm10, %v2626_v17 }
 0x840   :  { %2405 = vmatpush3.msk.msra.mxu0 %vm3551_vm10, %v2626_v17 }
 0x841   :  { %2406 = vmatprep.subr.msk.mxu0 %vm3552_vm11, %v2626_v17 }
 0x842   :  { %2407 = vmatpush3.msk.msra.mxu0 %vm3552_vm11, %v2626_v17 }
 0x843   :  { %2408 = vmatprep.subr.msk.mxu0 %vm3553_vm12, %v2626_v17 }
 0x844   :  { %2409 = vmatpush3.msk.msra.mxu0 %vm3553_vm12, %v2626_v17 }
 0x845   :  { %2410 = vmatprep.subr.msk.mxu0 %vm2952_vm0, %v2626_v17 }
 0x846   :  { %2411 = vmatpush3.msk.msra.mxu0 %vm2952_vm0, %v2626_v17  ;;  %vm3555_vm0 = vmmov %vm3549_vm9 }
 0x847   :  { %2415 = vmatprep.subr.msk.mxu0 %vm3554_vm1, %v2973_v26  ;;  %vm3556_vm14 = vmmov %vm3555_vm0 }
 0x848   :  { %vm3557_vm9 = vmmov %vm3555_vm0 }
 0x849   :  { %vm3558_vm13 = vmmov %vm3555_vm0 }
 0x84a   :  { %vm3559_vm10 = vmmov %vm3555_vm0 }
 0x84b   :  { %vm3560_vm11 = vmmov %vm3555_vm0 }
 0x84c   :  { %vm3561_vm12 = vmmov %vm3555_vm0 }
 0x84d   :  { %vm3562_vm1 = vmmov %vm3555_vm0 }
 0x8f7   :  { %v2268_v15 = vpop.f32.mrf.mxu0 }
 0x8f9   :  { %v2269_v63 = vpop.f32.mrf.mxu0 }
 0x8fa   :  { %v2270_v62 = vadd.f32 %v2269_v63, %v2268_v15  ;;  %v2091_v15 = vld [vmem:[%s3487_s6 + $0xa] ss:$0 sm:$0xff] }
 0x8fb   :  { %v2271_v2 = vpop.f32.mrf.mxu0 }
 0x8fc   :  { %v1022_v1 = vadd.f32 %v2270_v62, %v2073_v19 }
 0x8fd   :  { %v2272_v5 = vpop.f32.mrf.mxu0 }
 0x8fe   :  { %v3211_v44 = vadd.f32 %v1022_v1, %v3051_v60  ;;  %v2273_v47 = vadd.f32 %v2272_v5, %v2271_v2  ;;  %v2109_v5 = vld [vmem:[%s3487_s6 + $0xd] ss:$0 sm:$0xff] }
 0x900   :  { %v1025_v54 = vadd.f32 %v2273_v47, %v2073_v19  ;;  %v1039_v17 = vsel %vm3555_vm0, %v3211_v44, 0.0  ;;  %v1047_v7 = vmul.f32 %v3211_v44, %v3211_v44  ;;  %vm3563_vm0 = vnez %v3524_v39  ;;  %v2519_v39 = vld [vmem:[%s3484_s3 + $0x28] sm:$0xff]  }
 0x901   :  { %1040 = vadd.xlane.f32.xlu0 %v1039_v17 }
 0x902   :  { %v3218_v59 = vadd.f32 %v1025_v54, %v3058_v12  ;;  %v1049_v13 = vsel %vm3557_vm9, %v1047_v7, 0.0  ;;  %v2505_v12 = vld [vmem:[%s3483_s2 + $0x70] ss:$8 sps:$4 sm:$0xff]   ;;  %vm3565_vm9 = vmmov %vm3562_vm1 }
 0x903   :  { %1143 = vmatpush1.bf16.msra.mxu1 %v2505_v12 }
 0x904   :  { %v1042_v8 = vsel %vm3556_vm14, %v3218_v59, 0.0  ;;  %v1048_v60 = vmul.f32 %v3218_v59, %v3218_v59  ;;  %1144 = vmatprep.subr.bf16.mxu1 %v2510_v11  ;;  %vm3564_vm14 = vmmov %vm3562_vm1 }
 0x905   :  { %1043 = vadd.xlane.f32.xlu1 %v1042_v8  ;;  %1050 = vadd.xlane.f32.xlu0 %v1049_v13 }
 0x906   :  { %v1052_v14 = vsel %vm3558_vm13, %v1048_v60, 0.0  ;;  %vm3566_vm13 = vmmov %vm3562_vm1 }
 0x907   :  { %1145 = vmatpush1.bf16.msra.mxu1 %v2508_v18 }
 0x908   :  { %1146 = vmatprep.subr.bf16.mxu1 %v2513_v3 }
 0x909   :  { %1053 = vadd.xlane.f32.xlu1 %v1052_v14 }
 0x90b   :  { %1147 = vmatpush1.bf16.msra.mxu1 %v2511_v22 }
 0x90c   :  { %1148 = vmatprep.subr.bf16.mxu1 %v2516_v23 }
 0x90f   :  { %1149 = vmatpush1.bf16.msra.mxu1 %v2514_v24 }
 0x910   :  { %2384 = vmatprep.subr.bf16.mxu1 %v2623_v48 }
 0x91b   :  { %1188 = vrot.lane.b32.xlu0 %v2110_v4, %s2622_s27 }
 0x98a   :  { %v1041_v25 = vpop.xlane.xlu0 %1040 }
 0x98b   :  { %v1045_v27 = vmul.f32 0.015625, %v1041_v25 }
 0x98d   :  { %v1057_v6 = vmul.f32 %v1045_v27, %v1045_v27  ;;  %v1061_v45 = vsub.f32 %v3211_v44, %v1045_v27 }
 0x98e   :  { %v1044_v28 = vpop.xlane.xlu1 %1043  ;;  %v1051_v31 = vpop.xlane.xlu0 %1050 }
 0x98f   :  { %v1046_v32 = vmul.f32 0.015625, %v1044_v28  ;;  %v1055_v33 = vmul.f32 0.015625, %v1051_v31 }
 0x991   :  { %v1059_v34 = vsub.f32 %v1055_v33, %v1057_v6  ;;  %v1058_v36 = vmul.f32 %v1046_v32, %v1046_v32  ;;  %v1062_v51 = vsub.f32 %v3218_v59, %v1046_v32 }
 0x992   :  { %v1054_v35 = vpop.xlane.xlu1 %1053  ;;  %v1189_v47 = vpop.permute.xlu0 %1188 }
 0x993   :  { %v1063_v37 = vadd.f32 1e-05, %v1059_v34  ;;  %v1056_v41 = vmul.f32 0.015625, %v1054_v35 }
 0x995   :  { %2573 = vrsqrt.f32 %v1063_v37  ;;  %v1060_v42 = vsub.f32 %v1056_v41, %v1058_v36 }
 0x997   :  { %v1064_v43 = vadd.f32 1e-05, %v1060_v42 }
 0x999   :  { %2575 = vrsqrt.f32 %v1064_v43 }
 0x9a2   :  { %v2574_v46 = vpop.eup %2573 }
 0x9a3   :  { %v1067_v49 = vmul.f32 %v2574_v46, %v1061_v45 }
 0x9a5   :  { %v1073_v57 = vmul.f32 %v2090_v50, %v1067_v49 }
 0x9a6   :  { %v2576_v55 = vpop.eup %2575 }
 0x9a7   :  { %v1068_v56 = vmul.f32 %v2576_v55, %v1062_v51  ;;  %v1079_v63 = vadd.f32 %v2091_v15, %v1073_v57 }
 0x9a9   :  { %v1074_v19 = vmul.f32 %v2090_v50, %v1068_v56 }
 0x9ab   :  { %v1080_v62 = vadd.f32 %v2091_v15, %v1074_v19 }
 0x9ad   :  { %v1081_v2 = vpack.c.bf16 %v1080_v62, %v1079_v63 }
 0x9af   :  { %2108 = vmatmul.mubr.msk.bf16.vlgmr.msra.gmra.mxu1 %vm3559_vm10, %v1081_v2  ;;  %vm3567_vm10 = vmmov %vm3562_vm1 }
 0x9b0   :  { %2392 = vmatprep.mubr.msk.bf16.mxu1 %vm3543_vm15, %v2623_v48 }
 0xa6f   :  { %v1168_v1 = vpop.f32.mrf.mxu1 }
 0xa70   :  { %v1181_v7 = vadd.f32 %v2109_v5, %v1168_v1  ;;  %v1191_v8 = vadd.f32 %v1189_v47, %v1168_v1 }
 0xa71   :  { %v3269_v54 = vpop.f32.mrf.mxu1 }
 0xa73   :  { %v1172_v17 = vpop.f32.mrf.mxu1 }
 0xa74   :  { %v1182_v13 = vadd.f32 %v2109_v5, %v1172_v17  ;;  %v1192_v60 = vadd.f32 %v1189_v47, %v1172_v17  ;;  %v2111_v17 = vld [vmem:[%s3487_s6 + $0xf] ss:$0 sm:$0xff] }
 0xa75   :  { %v1174_v41 = vpop.f32.mrf.mxu1 }
 0xa76   :  { %v1219_v14 = vpack.c.bf16 %v1182_v13, %v1181_v7  ;;  %v2456_v0 = vpack.i.bf16 %v1192_v60, %v1191_v8  ;;  %v1198_v7 = vadd.f32 %v2111_v17, %v1174_v41  ;;  %v1197_v8 = vadd.f32 %v2111_v17, %v3269_v54  ;;  %v2529_v41 = vld [vmem:[%s3485_s4 + $0x54] ss:$8 sps:$4 sm:$0xff]  }
 0xa78   :  { %2457 = vrot.lane.b32.xlu1 %v2456_v0, %s2622_s27 }
 0xaea   :  { %v2458_v12 = vpop.permute.xlu1 %2457 }
 0xaeb   :  { %v2460_v11 = vunpack.i.h.bf16 %v2458_v12  ;;  %v2459_v18 = vunpack.i.l.bf16 %v2458_v12 }
 0xaed   :  { %v1213_v22 = vsel %vm2770_vm2, %v2459_v18, 0.0  ;;  %v1214_v3 = vsel %vm2777_vm3, %v2460_v11, 0.0  ;;  %v1211_v4 = vsel %vm2793_vm4, %v2459_v18, 0.0  ;;  %v1212_v25 = vsel %vm2800_vm5, %v2460_v11, 0.0 }
 0xaee   :  { %v1218_v23 = vpack.c.bf16 %v1214_v3, %v1213_v22  ;;  %v1217_v27 = vpack.c.bf16 %v1212_v25, %v1211_v4  ;;  %v1209_v31 = vsel %vm2818_vm6, %v2459_v18, 0.0  ;;  %v1210_v6 = vsel %vm2823_vm7, %v2460_v11, 0.0 }
 0xaef   :  { %v1216_v32 = vpack.c.bf16 %v1210_v6, %v1209_v31  ;;  %v1207_v34 = vsel %vm2839_vm8, %v2459_v18, 0.0  ;;  %v1208_v35 = vsel %vm3563_vm0, %v2460_v11, 0.0 }
 0xaf0   :  { %v1233_v24 = vsel %vm3560_vm11, %v1218_v23, 0  ;;  %v1230_v28 = vsel %vm3561_vm12, %v1217_v27, 0  ;;  %v1215_v36 = vpack.c.bf16 %v1208_v35, %v1207_v34  ;;  %vm3568_vm11 = vmmov %vm3562_vm1  ;;  %v2523_v34 = vld [vmem:[%s3485_s4 + $0x74] ss:$8 sps:$4 sm:$0xff]   ;;  %v2526_v35 = vld [vmem:[%s3485_s4 + $0x64] ss:$8 sps:$4 sm:$0xff]  }
 0xaf1   :  { %2385 = vmatpush3.bf16.xpose.msra.mxu1 %v1233_v24  ;;  %v1227_v33 = vsel %vm3562_vm1, %v1216_v32, 0  ;;  %vm3569_vm12 = vmmov %vm3562_vm1  ;;  %vm3570_vm1 = vcmask 1043456  }
 0xaf2   :  { %2386 = vmatprep.subr.bf16.mxu1 %v2623_v48  ;;  %v1224_v37 = vsel %vm3564_vm14, %v1215_v36, 0  ;;  %vm3571_vm14 = vcmask 31744   ;;  %v2524_v36 = vld [vmem:[%s3485_s4 + $0x60] ss:$8 sps:$4 sm:$0xff]  }
 0xaf9   :  { %2387 = vmatpush3.bf16.xpose.msra.mxu1 %v1230_v28 }
 0xafa   :  { %2388 = vmatprep.subr.bf16.mxu1 %v2623_v48 }
 0xb01   :  { %2389 = vmatpush3.bf16.xpose.msra.mxu1 %v1227_v33 }
 0xb02   :  { %2390 = vmatprep.subr.bf16.mxu1 %v2623_v48 }
 0xb09   :  { %2391 = vmatpush3.bf16.xpose.msra.mxu1 %v1224_v37  ;;  %v2527_v37 = vld [vmem:[%s3485_s4 + $0x50] ss:$8 sps:$4 sm:$0xff]  }
 0xb0a   :  { %2432 = vmatprep.subr.bf16.mxu1 %v2623_v48 }
 0xb10   :  { %2393 = vmatmul.mubr.msk.bf16.vlgmr.msra.gmra.mxu1 %vm3565_vm9, %v1219_v14  ;;  %v2127_v14 = vpack.c.bf16 %v1198_v7, %v1197_v8  ;;  %vm3572_vm9 = vmmov %vm3571_vm14 }
 0xb11   :  { %2440 = vmatprep.mubr.msk.bf16.mxu1 %vm3543_vm15, %v2623_v48  ;;  %2433 = vmatpush3.bf16.msra.mxu1 %v2517_v9 }
 0xb12   :  { %2434 = vmatprep.subr.bf16.mxu1 %v2623_v48 }
 0xb15   :  { %2435 = vmatpush3.bf16.msra.mxu1 %v2518_v10 }
 0xb16   :  { %2436 = vmatprep.subr.bf16.mxu1 %v2623_v48 }
 0xb19   :  { %2437 = vmatpush3.bf16.msra.mxu1 %v2519_v39  ;;  %v2537_v39 = vld [vmem:[%s3486_s5 + $0xe8] sm:$0xff]  }
 0xb1a   :  { %2438 = vmatprep.subr.bf16.mxu1 %v2623_v48 }
 0xbd0   :  { %v1269_v42 = vpop.f32.mrf.mxu1 }
 0xbd1   :  { %v1276_v43 = vmul.f32 0.25, %v1269_v42  ;;  %v2532_v42 = vld [vmem:[%s3485_s4 + $0x44] ss:$8 sps:$4 sm:$0xff]  }
 0xbd2   :  { %v2394_v45 = vpop.f32.mrf.mxu1 }
 0xbd3   :  { %v1278_v46 = vadd.f32 %v1276_v43, %v2862_v53  ;;  %v2530_v43 = vld [vmem:[%s3485_s4 + $0x40] ss:$8 sps:$4 sm:$0xff]  }
 0xbd4   :  { %v1272_v49 = vpop.f32.mrf.mxu1 }
 0xbd5   :  { %v1277_v50 = vmul.f32 0.25, %v1272_v49  ;;  %v1280_v51 = vsel %vm3566_vm13, %v1278_v46, -inf  ;;  %vm3573_vm13 = vmpackc.low %vm2777_vm3, %vm2770_vm2 }
 0xbd6   :  { %1281 = vmax.xlane.f32.xlu1 %v1280_v51  ;;  %v2395_v55 = vpop.f32.mrf.mxu1  ;;  %vm3576_vm2 = vmpackc.low %vm3563_vm0, %vm2839_vm8  ;;  %vm1972_vm0 = vcmask 1040384  }
 0xbd7   :  { %v1279_v56 = vadd.f32 %v1277_v50, %v2865_v58  ;;  %vm3577_vm3 = vmmov %vm3569_vm12 }
 0xbd8   :  { %vm3582_vm8 = vmmov %vm3577_vm3 }
 0xbd9   :  { %v1283_v57 = vsel %vm3567_vm10, %v1279_v56, -inf  ;;  %vm3574_vm10 = vmpackc.low %vm2800_vm5, %vm2793_vm4 }
 0xbda   :  { %1284 = vmax.xlane.f32.xlu0 %v1283_v57  ;;  %vm3578_vm4 = vmmov %vm3577_vm3 }
 0xbdb   :  { %vm3579_vm5 = vmmov %vm3577_vm3 }
 0xc5f   :  { %v1282_v15 = vpop.xlane.xlu1 %1281 }
 0xc60   :  { %v1286_v19 = vsub.f32 %v1278_v46, %v1282_v15 }
 0xc62   :  { %v1288_v63 = vmul.f32 1.442695, %v1286_v19 }
 0xc63   :  { %v1285_v62 = vpop.xlane.xlu0 %1284 }
 0xc64   :  { %2577 = vpow2.f32 %v1288_v63  ;;  %v1287_v2 = vsub.f32 %v1279_v56, %v1285_v62 }
 0xc66   :  { %v1290_v1 = vmul.f32 1.442695, %v1287_v2 }
 0xc68   :  { %2579 = vpow2.f32 %v1290_v1 }
 0xc71   :  { %v2578_v53 = vpop.eup %2577 }
 0xc72   :  { %2412 = vmatprep.mubr.msk.f32.mxu0 %vm3568_vm11, %v2578_v53  ;;  %vm3575_vm11 = vmpackc.low %vm2823_vm7, %vm2818_vm6 }
 0xc73   :  { %vm3580_vm6 = vmmov %vm3577_vm3 }
 0xc74   :  { %vm3581_vm7 = vmmov %vm3577_vm3 }
 0xc75   :  { %v2580_v5 = vpop.eup %2579 }
 0xc76   :  { %2413 = vmatmul.mubr.msk.f32.vlgmr.msra.gmra.mxu0 %vm3569_vm12, %v2580_v5  ;;  %vm1974_vm12 = vcmask 517120  }
 0xc77   :  { %2416 = vmatpush3.msk.msra.mxu0 %vm3570_vm1, %v2973_v26  ;;  %v2520_v26 = vld [vmem:[%s3484_s3 + $0x20] sm:$0xff]  }
 0xc78   :  { %2420 = vmatprep.subr.bf16.mxu0 %v2623_v48  ;;  %2439 = vmatpush3.bf16.msra.mxu1 %v2520_v26  ;;  %v2538_v26 = vld [vmem:[%s3486_s5 + $0xa8] sm:$0xff]  }
 0xd36   :  { %v2414_v58 = vpop.f32.mrf.mxu0 }
 0xd38   :  { %v1364_v47 = vpop.f32.mrf.mxu0 }
 0xd39   :  { %2581 = vrcp.f32 %v1364_v47  ;;  %v2153_v47 = vld [vmem:[%s3487_s6 + $0xb] ss:$0 sm:$0xff] }
 0xd3a   :  { %2583 = vrcp.f32 %v2414_v58 }
 0xd46   :  { %v2582_v13 = vpop.eup %2581 }
 0xd47   :  { %v2584_v60 = vpop.eup %2583  ;;  %2417 = vmatprep.mubr.msk.f32.mxu0 %vm3571_vm14, %v2582_v13 }
 0xd48   :  { %2418 = vmatmul.mubr.msk.f32.vlgmr.msra.gmra.mxu0 %vm3572_vm9, %v2584_v60  ;;  %v2154_v60 = vld [vmem:[%s3487_s6 + $0xc] ss:$0 sm:$0xff] }
 0xd49   :  { %2421 = vmatpush3.bf16.msk.msra.mxu0 %vm3573_vm13, %v2127_v14  ;;  %2428 = vmatprep.mubr.msk.bf16.mxu0 %vm3543_vm15, %v2623_v48  ;;  %vm3583_vm15 = vmmov %vm3577_vm3 }
 0xd4a   :  { %2422 = vmatprep.subr.bf16.mxu0 %v2623_v48 }
 0xd4d   :  { %2423 = vmatpush3.bf16.msk.msra.mxu0 %vm3574_vm10, %v2127_v14 }
 0xd4e   :  { %2424 = vmatprep.subr.bf16.mxu0 %v2623_v48 }
 0xd51   :  { %2425 = vmatpush3.bf16.msk.msra.mxu0 %vm3575_vm11, %v2127_v14 }
 0xd52   :  { %2426 = vmatprep.subr.bf16.mxu0 %v2623_v48 }
 0xd55   :  { %2427 = vmatpush3.bf16.msk.msra.mxu0 %vm3576_vm2, %v2127_v14 }
 0xd56   :  { %1715 = vmatprep.subr.bf16.mxu0 %v2523_v34 }
 0xe08   :  { %v2419_v20 = vpop.f32.mrf.mxu0 }
 0xe09   :  { %v1457_v29 = vmul.f32 %v2580_v5, %v2419_v20 }
 0xe0a   :  { %v1447_v21 = vpop.f32.mrf.mxu0 }
 0xe0b   :  { %v1456_v30 = vmul.f32 %v2578_v53, %v1447_v21  ;;  %v2533_v21 = vld [vmem:[%s3486_s5 + $0xf8] sm:$0xff]  }
 0xe0c   :  { %2302 = vmatprep.subr.bf16.mxu1 %v2533_v21 }
 0xe0d   :  { %v1470_v38 = vpack.c.bf16 %v1457_v29, %v1456_v30  ;;  %v2534_v29 = vld [vmem:[%s3486_s5 + $0xb8] sm:$0xff]   ;;  %v2535_v30 = vld [vmem:[%s3486_s5 + $0xf0] sm:$0xff]  }
 0xe0f   :  { %2429 = vmatmul.mubr.msk.bf16.vlgmr.msra.gmra.mxu0 %vm3577_vm3, %v1470_v38  ;;  %v2536_v38 = vld [vmem:[%s3486_s5 + $0xb0] sm:$0xff]  }
 0xe10   :  { %1739 = vmatprep.mubr.bf16.mxu0 %v2621_v16  ;;  %v2147_v16 = vld [vmem:[%s3487_s6 + $0x10] ss:$0 sm:$0xff] }
 0xecf   :  { %v1508_v54 = vpop.f32.mrf.mxu0 }
 0xed1   :  { %v2430_v0 = vpop.f32.mrf.mxu0 }
 0xed2   :  { %v2540_v0 = vld [vmem:[%s3486_s5 + $0xa0] sm:$0xff]  }
 0xed3   :  { %v1511_v12 = vpop.f32.mrf.mxu0 }
 0xed4   :  { %v1515_v11 = vpack.c.bf16 %v1511_v12, %v1508_v54  ;;  %v2539_v54 = vld [vmem:[%s3486_s5 + $0xe0] sm:$0xff]   ;;  %v2541_v12 = vld [vmem:[%s3486_s5 + $0xd8] sm:$0xff]  }
 0xed5   :  { %v2431_v18 = vpop.f32.mrf.mxu0 }
 0xed6   :  { %2441 = vmatmul.mubr.msk.bf16.vlgmr.msra.gmra.mxu1 %vm3578_vm4, %v1515_v11  ;;  %v2542_v11 = vld [vmem:[%s3486_s5 + $0x98] sm:$0xff]   ;;  %v2543_v18 = vld [vmem:[%s3486_s5 + $0xd0] sm:$0xff]  }
 0xed7   :  { %2303 = vmatpush3.bf16.msra.mxu1 %v2534_v29 }
 0xed8   :  { %2304 = vmatprep.subr.bf16.mxu1 %v2535_v30 }
 0xedb   :  { %2305 = vmatpush3.bf16.msra.mxu1 %v2536_v38 }
 0xedc   :  { %2306 = vmatprep.subr.bf16.mxu1 %v2537_v39  ;;  %v2205_v39 = vld [vmem:[%s3487_s6 + $0x11] ss:$0 sm:$0xff] }
 0xedf   :  { %2307 = vmatpush3.bf16.msra.mxu1 %v2538_v26 }
 0xee0   :  { %2308 = vmatprep.subr.bf16.mxu1 %v2539_v54 }
 0xee3   :  { %2309 = vmatpush3.bf16.msra.mxu1 %v2540_v0 }
 0xee4   :  { %2310 = vmatprep.subr.bf16.mxu1 %v2541_v12 }
 0xee7   :  { %2311 = vmatpush3.bf16.msra.mxu1 %v2542_v11 }
 0xee8   :  { %2312 = vmatprep.subr.bf16.mxu1 %v2543_v18 }
 0xf96   :  { %v1590_v22 = vpop.f32.mrf.mxu1 }
 0xf97   :  { %v1591_v3 = vadd.f32 %v2147_v16, %v1590_v22  ;;  %v2545_v22 = vld [vmem:[%s3486_s5 + $0xc8] sm:$0xff]  }
 0xf98   :  { %v2442_v23 = vpop.f32.mrf.mxu1 }
 0xf99   :  { %v3361_v48 = vadd.f32 %v1591_v3, %v3211_v44  ;;  %v2546_v3 = vld [vmem:[%s3486_s5 + $0x88] sm:$0xff]   ;;  %v2547_v23 = vld [vmem:[%s3486_s5 + $0xc0] sm:$0xff]  }
 0xf9a   :  { %v1593_v24 = vpop.f32.mrf.mxu1 }
 0xf9b   :  { %v1594_v4 = vadd.f32 %v2147_v16, %v1593_v24  ;;  %v1599_v25 = vsel %vm3579_vm5, %v3361_v48, 0.0  ;;  %v1607_v27 = vmul.f32 %v3361_v48, %v3361_v48  ;;  %v2544_v16 = vld [vmem:[%s3486_s5 + $0x90] sm:$0xff]   ;;  %v2548_v24 = vld [vmem:[%s3486_s5 + $0x80] sm:$0xff]  }
 0xf9c   :  { %1600 = vadd.xlane.f32.xlu0 %v1599_v25  ;;  %v2443_v28 = vpop.f32.mrf.mxu1  ;;  %2313 = vmatpush3.bf16.msra.mxu1 %v2544_v16 }
 0xf9d   :  { %v3368_v31 = vadd.f32 %v1594_v4, %v3218_v59  ;;  %v1609_v6 = vsel %vm3580_vm6, %v1607_v27, 0.0  ;;  %v2521_v59 = vld [vmem:[%s3485_s4 + $0x70] ss:$8 sps:$4 sm:$0xff]   ;;  %2314 = vmatprep.subr.bf16.mxu1 %v2545_v22  ;;  %v2163_v4 = vld [vmem:[%s3488_s7 + $0x1] ss:$2 sm:$0x3] }
 0xf9e   :  { %1716 = vmatpush1.bf16.msra.mxu0 %v2521_v59  ;;  %v1657_v25 = vrot.slane %v2163_v4, %v723_v52  ;;  %v1661_v27 = vrot.slane %v2163_v4, %v727_v40 }
 0xf9f   :  { %v1602_v32 = vsel %vm3581_vm7, %v3368_v31, 0.0  ;;  %v1608_v44 = vmul.f32 %v3368_v31, %v3368_v31  ;;  %1717 = vmatprep.subr.bf16.mxu0 %v2526_v35 }
 0xfa0   :  { %1610 = vadd.xlane.f32.xlu0 %v1609_v6  ;;  %1603 = vadd.xlane.f32.xlu1 %v1602_v32 }
 0xfa1   :  { %v1612_v33 = vsel %vm3582_vm8, %v1608_v44, 0.0  ;;  %2315 = vmatpush3.bf16.msra.mxu1 %v2546_v3 }
 0xfa2   :  { %1718 = vmatpush1.bf16.msra.mxu0 %v2524_v36  ;;  %2316 = vmatprep.subr.bf16.mxu1 %v2547_v23 }
 0xfa3   :  { %1719 = vmatprep.subr.bf16.mxu0 %v2529_v41 }
 0xfa4   :  { %1613 = vadd.xlane.f32.xlu1 %v1612_v33 }
 0xfa5   :  { %2317 = vmatpush3.bf16.msra.mxu1 %v2548_v24 }
 0xfa6   :  { %1720 = vmatpush1.bf16.msra.mxu0 %v2527_v37 }
 0xfa7   :  { %1721 = vmatprep.subr.bf16.mxu0 %v2532_v42 }
 0xfaa   :  { %1722 = vmatpush1.bf16.msra.mxu0 %v2530_v43 }
0x1025   :  { %v1601_v45 = vpop.xlane.xlu0 %1600 }
0x1026   :  { %v1605_v46 = vmul.f32 0.015625, %v1601_v45 }
0x1028   :  { %v1617_v51 = vmul.f32 %v1605_v46, %v1605_v46  ;;  %v1621_v53 = vsub.f32 %v3361_v48, %v1605_v46 }
0x1029   :  { %v1611_v49 = vpop.xlane.xlu0 %1610  ;;  %v1604_v50 = vpop.xlane.xlu1 %1603 }
0x102a   :  { %v1615_v55 = vmul.f32 0.015625, %v1611_v49  ;;  %v1606_v56 = vmul.f32 0.015625, %v1604_v50 }
0x102c   :  { %v1619_v57 = vsub.f32 %v1615_v55, %v1617_v51  ;;  %v1618_v63 = vmul.f32 %v1606_v56, %v1606_v56  ;;  %v1622_v17 = vsub.f32 %v3368_v31, %v1606_v56 }
0x102d   :  { %v1614_v15 = vpop.xlane.xlu1 %1613 }
0x102e   :  { %v1623_v19 = vadd.f32 1e-05, %v1619_v57  ;;  %v1616_v62 = vmul.f32 0.015625, %v1614_v15 }
0x1030   :  { %2585 = vrsqrt.f32 %v1623_v19  ;;  %v1620_v2 = vsub.f32 %v1616_v62, %v1618_v63 }
0x1032   :  { %v1624_v1 = vadd.f32 1e-05, %v1620_v2 }
0x1034   :  { %2587 = vrsqrt.f32 %v1624_v1 }
0x103d   :  { %v2586_v5 = vpop.eup %2585 }
0x103e   :  { %v1627_v58 = vmul.f32 %v2586_v5, %v1621_v53 }
0x1040   :  { %v1633_v13 = vmul.f32 %v2153_v47, %v1627_v58 }
0x1041   :  { %v2588_v7 = vpop.eup %2587 }
0x1042   :  { %v1628_v8 = vmul.f32 %v2588_v7, %v1622_v17  ;;  %v1639_v9 = vadd.f32 %v2154_v60, %v1633_v13 }
0x1044   :  { %v1634_v14 = vmul.f32 %v2153_v47, %v1628_v8 }
0x1046   :  { %v1640_v10 = vadd.f32 %v2154_v60, %v1634_v14 }
0x1048   :  { %v1641_v20 = vpack.c.bf16 %v1640_v10, %v1639_v9 }
0x104a   :  { %2172 = vmatmul.mubr.msk.bf16.vlgmr.msra.gmra.mxu0 %vm3583_vm15, %v1641_v20 }
0x110a   :  { %v1741_v28 = vpop.f32.mrf.mxu0 }
0x110b   :  { %v1742_v6 = vadd.f32 %v1741_v28, %v1657_v25 }
0x110c   :  { %v1743_v32 = vpop.f32.mrf.mxu0 }
0x110d   :  { %v1750_v44 = vmul.f32 %v1742_v6, %v1742_v6  ;;  %v1744_v33 = vadd.f32 %v1743_v32, %v1661_v27 }
0x110e   :  { %v1745_v34 = vpop.f32.mrf.mxu0 }
0x110f   :  { %v1754_v59 = vmul.f32 %v1750_v44, %v1742_v6  ;;  %v1751_v35 = vmul.f32 %v1744_v33, %v1744_v33  ;;  %v1746_v36 = vadd.f32 %v1745_v34, %v1657_v25 }
0x1110   :  { %v1747_v37 = vpop.f32.mrf.mxu0 }
0x1111   :  { %v1758_v41 = vmul.f32 0.044715, %v1754_v59  ;;  %v1755_v42 = vmul.f32 %v1751_v35, %v1744_v33  ;;  %v1752_v43 = vmul.f32 %v1746_v36, %v1746_v36  ;;  %v1748_v45 = vadd.f32 %v1747_v37, %v1661_v27 }
0x1113   :  { %v1762_v46 = vadd.f32 %v1758_v41, %v1742_v6  ;;  %v1759_v49 = vmul.f32 0.044715, %v1755_v42  ;;  %v1756_v52 = vmul.f32 %v1752_v43, %v1746_v36  ;;  %v1753_v50 = vmul.f32 %v1748_v45, %v1748_v45  ;;  %v2223_v41 = vld [vmem:[%s3487_s6 + $0x13] ss:$0 sm:$0xff] }
0x1115   :  { %v1766_v61 = vmul.f32 0.7978846, %v1762_v46  ;;  %v1763_v40 = vadd.f32 %v1759_v49, %v1744_v33  ;;  %v1760_v51 = vmul.f32 0.044715, %v1756_v52  ;;  %v1757_v55 = vmul.f32 %v1753_v50, %v1748_v45 }
0x1117   :  { %v1767_v56 = vmul.f32 0.7978846, %v1763_v40  ;;  %v1764_v57 = vadd.f32 %v1760_v51, %v1746_v36  ;;  %v1761_v15 = vmul.f32 0.044715, %v1757_v55  ;;  %2589 = vtanh.f32 %v1766_v61 }
0x1119   :  { %2591 = vtanh.f32 %v1767_v56  ;;  %v1768_v19 = vmul.f32 0.7978846, %v1764_v57  ;;  %v1765_v63 = vadd.f32 %v1761_v15, %v1748_v45 }
0x111b   :  { %2593 = vtanh.f32 %v1768_v19  ;;  %v1769_v62 = vmul.f32 0.7978846, %v1765_v63 }
0x111d   :  { %2595 = vtanh.f32 %v1769_v62 }
0x1124   :  { %v2590_v2 = vpop.eup %2589 }
0x1125   :  { %v1774_v58 = vadd.f32 1.0, %v2590_v2 }
0x1126   :  { %v2592_v1 = vpop.eup %2591 }
0x1127   :  { %v1775_v53 = vadd.f32 1.0, %v2592_v1  ;;  %v1778_v60 = vmul.f32 0.5, %v1774_v58 }
0x1128   :  { %v2594_v5 = vpop.eup %2593 }
0x1129   :  { %v1776_v47 = vadd.f32 1.0, %v2594_v5  ;;  %v1779_v13 = vmul.f32 0.5, %v1775_v53  ;;  %v1782_v21 = vmul.f32 %v1778_v60, %v1742_v6 }
0x112a   :  { %v2596_v17 = vpop.eup %2595 }
0x112b   :  { %v1780_v7 = vmul.f32 0.5, %v1776_v47  ;;  %v1777_v8 = vadd.f32 1.0, %v2596_v17  ;;  %v1783_v10 = vmul.f32 %v1779_v13, %v1744_v33 }
0x112d   :  { %v1781_v14 = vmul.f32 0.5, %v1777_v8  ;;  %v1784_v9 = vmul.f32 %v1780_v7, %v1746_v36  ;;  %v2222_v36 = vld [vmem:[%s3487_s6 + $0x12] ss:$0 sm:$0xff] }
0x112f   :  { %v1785_v20 = vmul.f32 %v1781_v14, %v1748_v45  ;;  %v1786_v30 = vpack.c.bf16 %v1784_v9, %v1782_v21 }
0x1131   :  { %v1787_v29 = vpack.c.bf16 %v1785_v20, %v1783_v10 }
0x1133   :  { %1953 = vmatprep.mubr.bf16.mxu1 %v1787_v29 }
0x1134   :  { %1954 = vmatmul.mubr.bf16.vlgmr.msra.gmra.mxu1 %v1786_v30 }
0x11f4   :  { %v2318_v38 = vpop.f32.mrf.mxu1 }
0x11f6   :  { %v2319_v26 = vpop.f32.mrf.mxu1 }
0x11f7   :  { %v2320_v54 = vadd.f32 %v2319_v26, %v2318_v38 }
0x11f8   :  { %v2321_v0 = vpop.f32.mrf.mxu1 }
0x11f9   :  { %v1956_v12 = vadd.f32 %v2320_v54, %v2205_v39 }
0x11fa   :  { %v2322_v11 = vpop.f32.mrf.mxu1 }
0x11fb   :  { %v2323_v18 = vadd.f32 %v2322_v11, %v2321_v0  ;;  %v1962_v16 = vadd.f32 %v1956_v12, %v3361_v48 }
0x11fd   :  { %v1959_v22 = vadd.f32 %v2323_v18, %v2205_v39  ;;  %v1967_v23 = vrot.slane %v1962_v16, 7 }
0x11ff   :  { %v1963_v3 = vadd.f32 %v1959_v22, %v3368_v31 }
0x1201   :  { %v1970_v24 = vrot.slane %v1963_v3, 6 }
0x1203   :  { %v1973_v4 = vsel %vm1972_vm0, %v1967_v23, %v1970_v24 }
0x1204   :  { %v1975_v25 = vsel %vm1974_vm12, %v1973_v4, 0.0  ;;  %v1979_v27 = vmul.f32 %v1973_v4, %v1973_v4 }
0x1205   :  { %1976 = vadd.xlane.f32.xlu0 %v1975_v25 }
0x1206   :  { %v1980_v28 = vsel %vm1974_vm12, %v1979_v27, 0.0 }
0x1207   :  { %1981 = vadd.xlane.f32.xlu1 %v1980_v28 }
0x128e   :  { %v1977_v6 = vpop.xlane.xlu0 %1976 }
0x128f   :  { %v1978_v32 = vmul.f32 0.015625, %v1977_v6 }
0x1290   :  { %v1982_v44 = vpop.xlane.xlu1 %1981 }
0x1291   :  { %v1984_v33 = vmul.f32 %v1978_v32, %v1978_v32  ;;  %v1983_v48 = vmul.f32 0.015625, %v1982_v44  ;;  %v1986_v31 = vsub.f32 %v1973_v4, %v1978_v32 }
0x1293   :  { %v1985_v34 = vsub.f32 %v1983_v48, %v1984_v33 }
0x1295   :  { %v1987_v59 = vadd.f32 1e-05, %v1985_v34 }
0x1297   :  { %2597 = vrsqrt.f32 %v1987_v59 }
0x12a4   :  { %v2598_v35 = vpop.eup %2597 }
0x12a5   :  { %v1989_v37 = vmul.f32 %v2598_v35, %v1986_v31 }
0x12a7   :  { %v1994_v42 = vmul.f32 %v2222_v36, %v1989_v37 }
0x12a9   :  { %v1999_v43 = vadd.f32 %v2223_v41, %v1994_v42 }
0x12ab   :  { %2000 = vst.msk [vmem:[#allocation2] sm:$0x3] %vm1974_vm12, %v1999_v43 }
0x12ac   :  { %2610 = shalt.err (!%p2607_p4)
}
0x12ad   :  { %2010 = dma.vmem_to_hbm [thread:$0]  %s2008_s24, 32, %s3489_s8, [#allocation3]  }
0x12ae   :  { %2619 = dma.done.wait [#allocation3], 32  }
0x12af   :  { %2620 = vsyncadd [#allocation3], 4294967264 }
0x12b0   :  { %2014 = vsyncpa [#allocation3], 1 }

</bundles_post_ra>
